<compile_context>
chip_gen: v7x
topology: tpu7x:2x2x1
jax: 0.10.0
libtpu: 0.0.40
codegen_flags: <defaults>
</compile_context>

<pallas_src>
import functools

import jax
import jax.numpy as jnp
from jax import lax
from jax.experimental import pallas as pl
from jax.experimental.pallas import tpu as pltpu

Z_DIM = 256
Y_EMBED = 256
NUM_CLASSES = 10
EPSILON = 0.1
BN_EPS = 1e-5
HIDDEN = Z_DIM + Y_EMBED  # 512


def _full_spec(shape):
    nd = len(shape)
    return pl.BlockSpec(shape, lambda *_: (0,) * nd)


# --------------------------------------------------------------- fused kernel
def _fused_kernel(z_ref, onehot_ref, emb_ref, w1z_ref, w1y_ref, b1_ref,
                  w2_ref, b2_ref, o_ref, *, epsilon):
    z = z_ref[...]                                                  # (B, 256)

    # Embedding lookup via one-hot matmul, then per-row L2 normalization.
    yembed = jnp.dot(onehot_ref[...], emb_ref[...],
                     preferred_element_type=jnp.float32)            # (B, 256)
    norm = jnp.sqrt(jnp.sum(yembed * yembed, axis=-1, keepdims=True))
    yembed = yembed / norm

    # l1 applied to concat([z, yembed]) as a split matmul (no lane concat).
    h = (jnp.dot(z, w1z_ref[...], preferred_element_type=jnp.float32)
         + jnp.dot(yembed, w1y_ref[...], preferred_element_type=jnp.float32)
         + b1_ref[...])                                             # (B, 512)

    # BatchNorm1d, training mode on a fresh module: batch statistics,
    # biased variance, affine weight=1 / bias=0.
    mean = jnp.mean(h, axis=0, keepdims=True)
    var = jnp.mean((h - mean) ** 2, axis=0, keepdims=True)
    h = (h - mean) * lax.rsqrt(var + BN_EPS)

    # activation_fn = nn.ReLU
    h = jnp.maximum(h, 0.0)

    out = jnp.dot(h, w2_ref[...], preferred_element_type=jnp.float32) + b2_ref[...]
    out = jnp.tanh(out) * 0.5 + 0.5                                 # (B, 256)
    o_ref[...] = z + epsilon * out


def atk_generator_pallas(z, y, kparams):
    """z: (B, 256) f32, y: (B,) int32 class ids, kparams: kernel-layout params."""
    B = z.shape[0]
    onehot = jax.nn.one_hot(y, NUM_CLASSES, dtype=jnp.float32)      # (B, 10)
    args = (z, onehot, kparams["emb_w"], kparams["w1z"], kparams["w1y"],
            kparams["b1"], kparams["w2"], kparams["b2"])
    return pl.pallas_call(
        functools.partial(_fused_kernel, epsilon=EPSILON),
        out_shape=jax.ShapeDtypeStruct((B, Z_DIM), jnp.float32),
        grid=(1,),
        in_specs=[_full_spec(a.shape) for a in args],
        out_specs=_full_spec((B, Z_DIM)),
        compiler_params=pltpu.CompilerParams(
            dimension_semantics=("arbitrary",)),
    )(*args)


# ----------------------------------------------------------- parameter setup
def init_params(key):
    """PyTorch-layout parameters (Linear weights are (out, in))."""
    ks = jax.random.split(key, 5)

    def xavier(k, shape, gain):                    # torch xavier_uniform_
        fan_out, fan_in = shape
        a = gain * (6.0 / (fan_in + fan_out)) ** 0.5
        return jax.random.uniform(k, shape, jnp.float32, -a, a)

    def bias(k, n, fan_in):                        # torch Linear default bias
        a = (1.0 / fan_in) ** 0.5
        return jax.random.uniform(k, (n,), jnp.float32, -a, a)

    g = 2.0 ** 0.5
    return {
        "emb_w": xavier(ks[0], (NUM_CLASSES, Y_EMBED), g),
        "l1_w": xavier(ks[1], (HIDDEN, HIDDEN), g),
        "l1_b": bias(ks[2], HIDDEN, HIDDEN),
        "l2_w": xavier(ks[3], (Z_DIM, HIDDEN), g),
        "l2_b": bias(ks[4], Z_DIM, HIDDEN),
    }


def to_kernel_params(params):
    """One-time layout prep: transpose to (in, out), split W1 into z/yembed halves."""
    w1_t = jnp.transpose(params["l1_w"])           # (512 in, 512 out)
    return {
        "emb_w": params["emb_w"],                  # (10, 256)
        "w1z": w1_t[:Z_DIM],                       # (256, 512)
        "w1y": w1_t[Z_DIM:],                       # (256, 512)
        "b1": params["l1_b"][None, :],             # (1, 512)
        "w2": jnp.transpose(params["l2_w"]),       # (512, 256)
        "b2": params["l2_b"][None, :],             # (1, 256)
    }


# ----------------------------------------------------------- plain-JAX reference
def atk_generator_ref(z, y, params):
    yembed = params["emb_w"][y]
    yembed = yembed / jnp.linalg.norm(yembed, axis=1, keepdims=True)
    yz = jnp.concatenate([z, yembed], axis=1)
    h = yz @ params["l1_w"].T + params["l1_b"]
    mean = h.mean(axis=0, keepdims=True)
    var = ((h - mean) ** 2).mean(axis=0, keepdims=True)
    h = (h - mean) / jnp.sqrt(var + BN_EPS)
    h = jax.nn.relu(h)
    out = h @ params["l2_w"].T + params["l2_b"]
    out = jnp.tanh(out) * 0.5 + 0.5
    return z + EPSILON * out


if __name__ == "__main__":
    key = jax.random.PRNGKey(0)
    kz, ky, kp = jax.random.split(key, 3)
    B = 2
    z = jax.random.normal(kz, (B, Z_DIM), jnp.float32)
    y = jax.random.randint(ky, (B,), 0, NUM_CLASSES, dtype=jnp.int32)

    params = init_params(kp)
    kparams = to_kernel_params(params)

    out = jax.block_until_ready(atk_generator_pallas(z, y, kparams))
    ref = atk_generator_ref(z, y, params)

    assert out.shape == (B, Z_DIM), out.shape
    err = float(jnp.max(jnp.abs(out - ref)))
    assert jnp.allclose(out, ref, atol=2e-4, rtol=2e-4), err
    print("KERNEL_OK")
</pallas_src>

<mosaic_0001>
module attributes {stable_mosaic.version = 11 : i64} {
  func.func @_fused_kernel(%arg0: i32, %arg1: memref<2x256xf32, #tpu.memory_space<vmem>>, %arg2: memref<2x10xf32, #tpu.memory_space<vmem>>, %arg3: memref<10x256xf32, #tpu.memory_space<vmem>>, %arg4: memref<256x512xf32, #tpu.memory_space<vmem>>, %arg5: memref<256x512xf32, #tpu.memory_space<vmem>>, %arg6: memref<1x512xf32, #tpu.memory_space<vmem>>, %arg7: memref<512x256xf32, #tpu.memory_space<vmem>>, %arg8: memref<1x256xf32, #tpu.memory_space<vmem>>, %arg9: memref<2x256xf32, #tpu.memory_space<vmem>>) attributes {dimension_semantics = [#tpu.dimension_semantics<arbitrary>], iteration_bounds = array<i64: 1>, scalar_prefetch = 0 : i64, scratch_operands = 0 : i64, tpu.core_type = #tpu.core_type<tc>, window_params = [{pipeline_mode = #tpu.pipeline_mode<synchronous>, transform_indices = @transform_0, window_bounds = array<i64: 2, 256>}, {pipeline_mode = #tpu.pipeline_mode<synchronous>, transform_indices = @transform_1, window_bounds = array<i64: 2, 10>}, {pipeline_mode = #tpu.pipeline_mode<synchronous>, transform_indices = @transform_2, window_bounds = array<i64: 10, 256>}, {pipeline_mode = #tpu.pipeline_mode<synchronous>, transform_indices = @transform_3, window_bounds = array<i64: 256, 512>}, {pipeline_mode = #tpu.pipeline_mode<synchronous>, transform_indices = @transform_4, window_bounds = array<i64: 256, 512>}, {pipeline_mode = #tpu.pipeline_mode<synchronous>, transform_indices = @transform_5, window_bounds = array<i64: 1, 512>}, {pipeline_mode = #tpu.pipeline_mode<synchronous>, transform_indices = @transform_6, window_bounds = array<i64: 512, 256>}, {pipeline_mode = #tpu.pipeline_mode<synchronous>, transform_indices = @transform_7, window_bounds = array<i64: 1, 256>}, {pipeline_mode = #tpu.pipeline_mode<synchronous>, transform_indices = @transform_8, window_bounds = array<i64: 2, 256>}]} {
    %c0 = arith.constant 0 : index
    %c0_0 = arith.constant 0 : index
    %0 = vector.load %arg1[%c0, %c0_0] : memref<2x256xf32, #tpu.memory_space<vmem>>, vector<2x256xf32>
    %c0_1 = arith.constant 0 : index
    %c0_2 = arith.constant 0 : index
    %1 = vector.load %arg2[%c0_1, %c0_2] : memref<2x10xf32, #tpu.memory_space<vmem>>, vector<2x10xf32>
    %c0_3 = arith.constant 0 : index
    %c0_4 = arith.constant 0 : index
    %2 = vector.load %arg3[%c0_3, %c0_4] : memref<10x256xf32, #tpu.memory_space<vmem>>, vector<10x256xf32>
    %cst = arith.constant dense<0.000000e+00> : vector<2x256xf32>
    %3 = tpu.matmul %1, %2, %cst {dimension_numbers = #tpu.dot_dimension_numbers<[1], [0], [0], [1], [0, 0, 1, 1], [], []>} : vector<2x10xf32>, vector<10x256xf32>, vector<2x256xf32> -> vector<2x256xf32>
    %4 = arith.mulf %3, %3 : vector<2x256xf32>
    %cst_5 = arith.constant dense<0.000000e+00> : vector<2xf32>
    %5 = vector.multi_reduction <add>, %4, %cst_5 [1] : vector<2x256xf32> to vector<2xf32>
    %6 = vector.shape_cast %5 : vector<2xf32> to vector<2x1xf32>
    %7 = math.sqrt %6 : vector<2x1xf32>
    %8 = vector.broadcast %7 : vector<2x1xf32> to vector<2x256xf32>
    %9 = arith.divf %3, %8 : vector<2x256xf32>
    %c0_6 = arith.constant 0 : index
    %c0_7 = arith.constant 0 : index
    %10 = vector.load %arg4[%c0_6, %c0_7] : memref<256x512xf32, #tpu.memory_space<vmem>>, vector<256x512xf32>
    %cst_8 = arith.constant dense<0.000000e+00> : vector<2x512xf32>
    %11 = tpu.matmul %0, %10, %cst_8 {dimension_numbers = #tpu.dot_dimension_numbers<[1], [0], [0], [1], [0, 0, 1, 1], [], []>} : vector<2x256xf32>, vector<256x512xf32>, vector<2x512xf32> -> vector<2x512xf32>
    %c0_9 = arith.constant 0 : index
    %c0_10 = arith.constant 0 : index
    %12 = vector.load %arg5[%c0_9, %c0_10] : memref<256x512xf32, #tpu.memory_space<vmem>>, vector<256x512xf32>
    %cst_11 = arith.constant dense<0.000000e+00> : vector<2x512xf32>
    %13 = tpu.matmul %9, %12, %cst_11 {dimension_numbers = #tpu.dot_dimension_numbers<[1], [0], [0], [1], [0, 0, 1, 1], [], []>} : vector<2x256xf32>, vector<256x512xf32>, vector<2x512xf32> -> vector<2x512xf32>
    %14 = arith.addf %11, %13 : vector<2x512xf32>
    %c0_12 = arith.constant 0 : index
    %c0_13 = arith.constant 0 : index
    %15 = vector.load %arg6[%c0_12, %c0_13] : memref<1x512xf32, #tpu.memory_space<vmem>>, vector<1x512xf32>
    %16 = vector.broadcast %15 : vector<1x512xf32> to vector<2x512xf32>
    %17 = arith.addf %14, %16 : vector<2x512xf32>
    %cst_14 = arith.constant dense<0.000000e+00> : vector<512xf32>
    %18 = vector.multi_reduction <add>, %17, %cst_14 [0] : vector<2x512xf32> to vector<512xf32>
    %19 = vector.shape_cast %18 : vector<512xf32> to vector<1x512xf32>
    %cst_15 = arith.constant 2.000000e+00 : f32
    %20 = vector.broadcast %cst_15 : f32 to vector<1x512xf32>
    %21 = arith.divf %19, %20 : vector<1x512xf32>
    %22 = vector.broadcast %21 : vector<1x512xf32> to vector<2x512xf32>
    %23 = arith.subf %17, %22 : vector<2x512xf32>
    %24 = arith.mulf %23, %23 : vector<2x512xf32>
    %cst_16 = arith.constant dense<0.000000e+00> : vector<512xf32>
    %25 = vector.multi_reduction <add>, %24, %cst_16 [0] : vector<2x512xf32> to vector<512xf32>
    %26 = vector.shape_cast %25 : vector<512xf32> to vector<1x512xf32>
    %cst_17 = arith.constant 2.000000e+00 : f32
    %27 = vector.broadcast %cst_17 : f32 to vector<1x512xf32>
    %28 = arith.divf %26, %27 : vector<1x512xf32>
    %29 = vector.broadcast %21 : vector<1x512xf32> to vector<2x512xf32>
    %30 = arith.subf %17, %29 : vector<2x512xf32>
    %cst_18 = arith.constant 9.99999974E-6 : f32
    %31 = vector.broadcast %cst_18 : f32 to vector<1x512xf32>
    %32 = arith.addf %28, %31 : vector<1x512xf32>
    %33 = math.rsqrt %32 : vector<1x512xf32>
    %34 = vector.broadcast %33 : vector<1x512xf32> to vector<2x512xf32>
    %35 = arith.mulf %30, %34 : vector<2x512xf32>
    %cst_19 = arith.constant 0.000000e+00 : f32
    %36 = vector.broadcast %cst_19 : f32 to vector<2x512xf32>
    %37 = arith.maximumf %35, %36 : vector<2x512xf32>
    %c0_20 = arith.constant 0 : index
    %c0_21 = arith.constant 0 : index
    %38 = vector.load %arg7[%c0_20, %c0_21] : memref<512x256xf32, #tpu.memory_space<vmem>>, vector<512x256xf32>
    %cst_22 = arith.constant dense<0.000000e+00> : vector<2x256xf32>
    %39 = tpu.matmul %37, %38, %cst_22 {dimension_numbers = #tpu.dot_dimension_numbers<[1], [0], [0], [1], [0, 0, 1, 1], [], []>} : vector<2x512xf32>, vector<512x256xf32>, vector<2x256xf32> -> vector<2x256xf32>
    %c0_23 = arith.constant 0 : index
    %c0_24 = arith.constant 0 : index
    %40 = vector.load %arg8[%c0_23, %c0_24] : memref<1x256xf32, #tpu.memory_space<vmem>>, vector<1x256xf32>
    %41 = vector.broadcast %40 : vector<1x256xf32> to vector<2x256xf32>
    %42 = arith.addf %39, %41 : vector<2x256xf32>
    %43 = math.tanh %42 : vector<2x256xf32>
    %cst_25 = arith.constant 5.000000e-01 : f32
    %44 = vector.broadcast %cst_25 : f32 to vector<2x256xf32>
    %45 = arith.mulf %43, %44 : vector<2x256xf32>
    %cst_26 = arith.constant 5.000000e-01 : f32
    %46 = vector.broadcast %cst_26 : f32 to vector<2x256xf32>
    %47 = arith.addf %45, %46 : vector<2x256xf32>
    %cst_27 = arith.constant 1.000000e-01 : f32
    %48 = vector.broadcast %cst_27 : f32 to vector<2x256xf32>
    %49 = arith.mulf %48, %47 : vector<2x256xf32>
    %50 = arith.addf %0, %49 : vector<2x256xf32>
    %c0_28 = arith.constant 0 : index
    %c0_29 = arith.constant 0 : index
    %51 = vector.load %arg9[%c0_28, %c0_29] : memref<2x256xf32, #tpu.memory_space<vmem>>, vector<2x256xf32>
    tpu.vector_store %arg9[%c0_28, %c0_29], %50 {strides = array<i32>} : memref<2x256xf32, #tpu.memory_space<vmem>>, vector<2x256xf32>,
    return
  }
  func.func @transform_0(%arg0: i32) -> (i32, i32) {
    %c0_i32 = arith.constant 0 : i32
    %c0_i32_0 = arith.constant 0 : i32
    %c0_i32_1 = arith.constant 0 : i32
    return %c0_i32, %c0_i32_0 : i32, i32
  }
  func.func @transform_1(%arg0: i32) -> (i32, i32) {
    %c0_i32 = arith.constant 0 : i32
    %c0_i32_0 = arith.constant 0 : i32
    %c0_i32_1 = arith.constant 0 : i32
    return %c0_i32, %c0_i32_0 : i32, i32
  }
  func.func @transform_2(%arg0: i32) -> (i32, i32) {
    %c0_i32 = arith.constant 0 : i32
    %c0_i32_0 = arith.constant 0 : i32
    %c0_i32_1 = arith.constant 0 : i32
    return %c0_i32, %c0_i32_0 : i32, i32
  }
  func.func @transform_3(%arg0: i32) -> (i32, i32) {
    %c0_i32 = arith.constant 0 : i32
    %c0_i32_0 = arith.constant 0 : i32
    %c0_i32_1 = arith.constant 0 : i32
    return %c0_i32, %c0_i32_0 : i32, i32
  }
  func.func @transform_4(%arg0: i32) -> (i32, i32) {
    %c0_i32 = arith.constant 0 : i32
    %c0_i32_0 = arith.constant 0 : i32
    %c0_i32_1 = arith.constant 0 : i32
    return %c0_i32, %c0_i32_0 : i32, i32
  }
  func.func @transform_5(%arg0: i32) -> (i32, i32) {
    %c0_i32 = arith.constant 0 : i32
    %c0_i32_0 = arith.constant 0 : i32
    %c0_i32_1 = arith.constant 0 : i32
    return %c0_i32, %c0_i32_0 : i32, i32
  }
  func.func @transform_6(%arg0: i32) -> (i32, i32) {
    %c0_i32 = arith.constant 0 : i32
    %c0_i32_0 = arith.constant 0 : i32
    %c0_i32_1 = arith.constant 0 : i32
    return %c0_i32, %c0_i32_0 : i32, i32
  }
  func.func @transform_7(%arg0: i32) -> (i32, i32) {
    %c0_i32 = arith.constant 0 : i32
    %c0_i32_0 = arith.constant 0 : i32
    %c0_i32_1 = arith.constant 0 : i32
    return %c0_i32, %c0_i32_0 : i32, i32
  }
  func.func @transform_8(%arg0: i32) -> (i32, i32) {
    %c0_i32 = arith.constant 0 : i32
    %c0_i32_0 = arith.constant 0 : i32
    %c0_i32_1 = arith.constant 0 : i32
    return %c0_i32, %c0_i32_0 : i32, i32
  }
}

</mosaic_0001>

<bundles_post_ra>
// kernel: tpu_custom_call.1
= control target key start
LH: loop header
LB: loop body
LE: loop exit
PB: predicated region body
PF: predicated region fallthrough
CT: control target
= control target key end

     0   :  { %13 = vsyncpa [#allocation3], 0  ;;  %s1975_s0 = inlined_call_operand.hbm [shape: f32[2,256], index: 0, kind: input, shape index: {}]   ;;  %s1976_s1 = inlined_call_operand.vmem [shape: f32[2,10], index: 1, kind: input, shape index: {}]   ;;  %s1977_s2 = inlined_call_operand.hbm [shape: f32[10,256], index: 2, kind: input, shape index: {}]   ;;  %s1978_s3 = inlined_call_operand.hbm [shape: f32[256,512], index: 3, kind: input, shape index: {}]   ;;  %s1979_s4 = inlined_call_operand.hbm [shape: f32[256,512], index: 4, kind: input, shape index: {}]   ;;  %s1980_s5 = inlined_call_operand.vmem [shape: f32[1,512], index: 5, kind: input, shape index: {}]   ;;  %s1981_s6 = inlined_call_operand.hbm [shape: f32[512,256], index: 6, kind: input, shape index: {}]   ;;  %s1982_s7 = inlined_call_operand.vmem [shape: f32[1,256], index: 7, kind: input, shape index: {}]   ;;  %s1983_s8 = inlined_call_operand.hbm [shape: f32[2,256], index: 8, kind: output, shape index: {}]  }
   0x1   :  { %14 = vsyncpa [#allocation6], 0 }
   0x2   :  { %15 = vsyncpa [#allocation9], 0 }
   0x3   :  { %16 = vsyncpa [#allocation4], 0  ;;  %s1759_s27 = smov [#allocation5]   ;;  %s1619_s9 = scalar_lea.hbm %s1977_s2, 512 }
   0x4   :  { %s34_s28 = sshll.u32 %s1759_s27, 4  ;;  %p1620_p0 = scmp.ne.s32.totalorder %s1977_s2, %s1619_s9  ;;  %s35_s28 = int_to_ptr.vmem [resolvable:$true] %s34_s28 }
   0x5   :  { %p1623_p1 = scmp.lt.u32.totalorder %s1619_s9, %s1977_s2 }
   0x7   :  { %p1625_p2 = pnand %p1623_p1, %p1620_p0 }
   0x9   :  { %1628 = shalt.err (!%p1625_p2)
}
   0xa   :  { %s1629_s14 = scalar_lea.vmem %s35_s28, 512  ;;  %p1634_p4 = scmp.lt.s32.totalorder %s35_s28, %s35_s28 }
   0xb   :  { %p1630_p3 = scmp.ne.s32.totalorder %s35_s28, %s1629_s14  ;;  %p1635_p5 = scmp.lt.s32.totalorder %s1629_s14, %s1629_s14 }
   0xd   :  { %p1636_p6 = por %p1635_p5, %p1634_p4 }
   0xf   :  { %p1637_p7 = pnand %p1636_p6, %p1630_p3 }
  0x11   :  { %1640 = shalt.err (!%p1637_p7)
}
  0x12   :  { %s1760_s15 = smov 256   ;;  %s1761_s16 = smov 16  }
  0x13   :  { %40 = dma.hbm_to_vmem [thread:$0]  %s1977_s2, 512, %s35_s28, [#allocation6], %s1760_s15, %s1760_s15, %s1761_s16  }
  0x14   :  { %s1762_s19 = smov [#allocation8]   ;;  %s1763_s21 = smov [#allocation2]  }
  0x15   :  { %s58_s20 = sshll.u32 %s1762_s19, 4  ;;  %s23_s22 = sshll.u32 %s1763_s21, 4  ;;  %s59_s20 = int_to_ptr.vmem [resolvable:$true] %s58_s20  ;;  %s24_s22 = int_to_ptr.vmem [resolvable:$true] %s23_s22 }
  0x16   :  { %s1641_s25 = scalar_lea.hbm %s1979_s4, 16384 }
  0x17   :  { %p1642_p8 = scmp.ne.s32.totalorder %s1979_s4, %s1641_s25  ;;  %p1645_p9 = scmp.lt.u32.totalorder %s1641_s25, %s1979_s4 }
  0x19   :  { %p1647_p10 = pnand %p1645_p9, %p1642_p8 }
  0x1b   :  { %1650 = shalt.err (!%p1647_p10)
}
  0x1c   :  { %s1651_s2 = scalar_lea.vmem %s59_s20, 16384  ;;  %p1656_p12 = scmp.lt.s32.totalorder %s59_s20, %s59_s20 }
  0x1d   :  { %p1652_p11 = scmp.ne.s32.totalorder %s59_s20, %s1651_s2  ;;  %p1657_p13 = scmp.lt.s32.totalorder %s1651_s2, %s1651_s2 }
  0x1f   :  { %p1658_p0 = por %p1657_p13, %p1656_p12 }
  0x21   :  { %p1659_p1 = pnand %p1658_p0, %p1652_p11 }
  0x23   :  { %1662 = shalt.err (!%p1659_p1)
}
  0x24   :  { %s1764_s28 = smov 512   ;;  %s1765_s9 = smov 32  }
  0x25   :  { %64 = dma.hbm_to_vmem [thread:$0]  %s1979_s4, 16384, %s59_s20, [#allocation9], %s1764_s28, %s1764_s28, %s1765_s9  }
  0x26   :  { %s1663_s14 = scalar_lea.hbm %s1975_s0, 64 }
  0x27   :  { %p1664_p2 = scmp.ne.s32.totalorder %s1975_s0, %s1663_s14  ;;  %p1667_p3 = scmp.lt.u32.totalorder %s1663_s14, %s1975_s0 }
  0x29   :  { %p1669_p4 = pnand %p1667_p3, %p1664_p2 }
  0x2b   :  { %1672 = shalt.err (!%p1669_p4)
}
  0x2c   :  { %s1673_s23 = scalar_lea.vmem %s24_s22, 64  ;;  %p1678_p6 = scmp.lt.s32.totalorder %s24_s22, %s24_s22 }
  0x2d   :  { %p1674_p5 = scmp.ne.s32.totalorder %s24_s22, %s1673_s23  ;;  %p1679_p7 = scmp.lt.s32.totalorder %s1673_s23, %s1673_s23 }
  0x2f   :  { %p1680_p8 = por %p1679_p7, %p1678_p6 }
  0x31   :  { %p1681_p9 = pnand %p1680_p8, %p1674_p5 }
  0x33   :  { %1684 = shalt.err (!%p1681_p9)
}
  0x34   :  { %26 = dma.hbm_to_vmem [thread:$0]  %s1975_s0, 64, %s24_s22, [#allocation3]  }
  0x35   :  { %s1766_s24 = smov [#allocation7]   ;;  %s1767_s26 = smov [#allocation10]  }
  0x36   :  { %s46_s25 = sshll.u32 %s1766_s24, 4  ;;  %s72_s27 = sshll.u32 %s1767_s26, 4  ;;  %s47_s25 = int_to_ptr.vmem [resolvable:$true] %s46_s25  ;;  %s73_s27 = int_to_ptr.vmem [resolvable:$true] %s72_s27 }
  0x37   :  { %s1685_s2 = scalar_lea.hbm %s1978_s3, 16384 }
  0x38   :  { %p1686_p10 = scmp.ne.s32.totalorder %s1978_s3, %s1685_s2  ;;  %p1689_p11 = scmp.lt.u32.totalorder %s1685_s2, %s1978_s3 }
  0x3a   :  { %p1691_p12 = pnand %p1689_p11, %p1686_p10 }
  0x3c   :  { %1694 = shalt.err (!%p1691_p12)
}
  0x3d   :  { %s1695_s0 = scalar_lea.vmem %s47_s25, 16384  ;;  %p1700_p0 = scmp.lt.s32.totalorder %s47_s25, %s47_s25 }
  0x3e   :  { %p1696_p13 = scmp.ne.s32.totalorder %s47_s25, %s1695_s0  ;;  %p1701_p1 = scmp.lt.s32.totalorder %s1695_s0, %s1695_s0 }
  0x40   :  { %p1702_p2 = por %p1701_p1, %p1700_p0 }
  0x42   :  { %p1703_p3 = pnand %p1702_p2, %p1696_p13 }
  0x44   :  { %1706 = shalt.err (!%p1703_p3)
}
  0x45   :  { %52 = dma.hbm_to_vmem [thread:$0]  %s1978_s3, 16384, %s47_s25, [#allocation6], %s1764_s28, %s1764_s28, %s1765_s9  }
  0x46   :  { %s1707_s19 = scalar_lea.hbm %s1981_s6, 16384 }
  0x47   :  { %p1708_p4 = scmp.ne.s32.totalorder %s1981_s6, %s1707_s19  ;;  %p1711_p5 = scmp.lt.u32.totalorder %s1707_s19, %s1981_s6 }
  0x49   :  { %p1713_p6 = pnand %p1711_p5, %p1708_p4 }
  0x4b   :  { %1716 = shalt.err (!%p1713_p6)
}
  0x4c   :  { %s1717_s24 = scalar_lea.vmem %s73_s27, 16384  ;;  %p1722_p8 = scmp.lt.s32.totalorder %s73_s27, %s73_s27 }
  0x4d   :  { %p1718_p7 = scmp.ne.s32.totalorder %s73_s27, %s1717_s24  ;;  %p1723_p9 = scmp.lt.s32.totalorder %s1717_s24, %s1717_s24 }
  0x4f   :  { %p1724_p10 = por %p1723_p9, %p1722_p8 }
  0x51   :  { %p1725_p11 = pnand %p1724_p10, %p1718_p7 }
  0x53   :  { %1728 = shalt.err (!%p1725_p11)
}
  0x54   :  { %78 = dma.hbm_to_vmem [thread:$0]  %s1981_s6, 16384, %s73_s27, [#allocation9], %s1760_s15, %s1760_s15, %s1761_s16  }
  0x55   :  { %1751 = dma.done.wait [#allocation3], 64  }
  0x56   :  { %1752 = vsyncadd [#allocation3], 4294967232 }
  0x57   :  { %1753 = dma.done.wait [#allocation6], 16896  }
  0x58   :  { %1754 = vsyncadd [#allocation6], 4294950400 }
  0x59   :  { %1755 = dma.done.wait [#allocation9], 32768  }
  0x5a   :  { %1756 = vsyncadd [#allocation9], 4294934528  ;;  %v1768_v0 = vmov 0.0   ;;  %vm106_vm0 = vcmask 1041408   ;;  %vm1769_vm1 = vmmov 1   ;;  %v99_v1 = vld [vmem:[#allocation5 + $0x8] sm:$0xff] }
  0x5b   :  { %177 = vmatprep.mubr.f32.mxu0 %v1768_v0  ;;  %vm1191_vm2 = vmpackc.low %vm106_vm0, %vm1769_vm1  ;;  %v101_v2 = vld [vmem:[#allocation5 + $0x18] sm:$0x3]  ;;  %v98_v3 = vld [vmem:[#allocation5] sm:$0xff]  ;;  %vm102_vm3 = vcmask 80896  }
  0x5c   :  { %v1190_v4 = vpack.c.bf16 %v101_v2, %v99_v1  ;;  %v100_v5 = vld [vmem:[#allocation5 + $0x10] sm:$0x3]  ;;  %v97_v7 = vld [vmem:[%s1976_s1] sm:$0x3]  ;;  %v330_v8 = vld [vmem:[#allocation8 + $0x8] sm:$0xff] }
  0x5d   :  { %v1193_v6 = vpack.c.bf16 %v100_v5, %v98_v3  ;;  %v334_v9 = vld [vmem:[#allocation8 + $0x28] sm:$0xff]  ;;  %v329_v10 = vld [vmem:[#allocation8] sm:$0xff] }
  0x5e   :  { %1192 = vmatprep.subr.msk.bf16.mxu0 %vm1191_vm2, %v1190_v4  ;;  %v1196_v11 = vpack.c.bf16 %v334_v9, %v330_v8  ;;  %v333_v12 = vld [vmem:[#allocation8 + $0x20] sm:$0xff]  ;;  %v202_v13 = vld [vmem:[#allocation7 + $0x8] sm:$0xff] }
  0x5f   :  { %1195 = vmatpush1.bf16.msk.msra.mxu0 %vm1191_vm2, %v1193_v6  ;;  %v206_v14 = vld [vmem:[#allocation7 + $0x28] sm:$0xff]  ;;  %v1198_v15 = vpack.c.bf16 %v333_v12, %v329_v10  ;;  %v201_v17 = vld [vmem:[#allocation7] sm:$0xff] }
  0x60   :  { %v1324_v16 = vpack.c.bf16 %v206_v14, %v202_v13  ;;  %v205_v18 = vld [vmem:[#allocation7 + $0x20] sm:$0xff]  ;;  %v338_v19 = vld [vmem:[#allocation8 + $0x48] sm:$0xff]  ;;  %1197 = vmatprep.subr.bf16.mxu0 %v1196_v11 }
  0x61   :  { %v1326_v20 = vpack.c.bf16 %v205_v18, %v201_v17  ;;  %v342_v21 = vld [vmem:[#allocation8 + $0x68] sm:$0xff]  ;;  %v337_v22 = vld [vmem:[#allocation8 + $0x40] sm:$0xff] }
  0x62   :  { %1189 = vmatmul.mubr.msk.f32.vlgmr.msra.gmra.mrb[0].mxu0 %vm102_vm3, %v97_v7  ;;  %v341_v23 = vld [vmem:[#allocation8 + $0x60] sm:$0xff]  ;;  %1325 = vmatprep.subr.bf16.mxu1 %v1324_v16  ;;  %v1200_v24 = vpack.c.bf16 %v342_v21, %v338_v19  ;;  %v210_v26 = vld [vmem:[#allocation7 + $0x48] sm:$0xff] }
  0x63   :  { %1199 = vmatpush1.bf16.msra.mxu0 %v1198_v15  ;;  %v1202_v25 = vpack.c.bf16 %v341_v23, %v337_v22  ;;  %v214_v27 = vld [vmem:[#allocation7 + $0x68] sm:$0xff]  ;;  %v209_v28 = vld [vmem:[#allocation7 + $0x40] sm:$0xff]  ;;  %1327 = vmatpush1.bf16.msra.mxu1 %v1326_v20 }
  0x64   :  { %v1328_v29 = vpack.c.bf16 %v214_v27, %v210_v26  ;;  %v213_v30 = vld [vmem:[#allocation7 + $0x60] sm:$0xff]  ;;  %v346_v31 = vld [vmem:[#allocation8 + $0x88] sm:$0xff]  ;;  %1201 = vmatprep.subr.bf16.mxu0 %v1200_v24 }
  0x65   :  { %v350_v32 = vld [vmem:[#allocation8 + $0xa8] sm:$0xff]  ;;  %v1330_v33 = vpack.c.bf16 %v213_v30, %v209_v28  ;;  %v345_v35 = vld [vmem:[#allocation8 + $0x80] sm:$0xff] }
  0x66   :  { %v1204_v34 = vpack.c.bf16 %v350_v32, %v346_v31  ;;  %v349_v36 = vld [vmem:[#allocation8 + $0xa0] sm:$0xff]  ;;  %v218_v37 = vld [vmem:[#allocation7 + $0x88] sm:$0xff]  ;;  %1329 = vmatprep.subr.bf16.mxu1 %v1328_v29 }
  0x67   :  { %v222_v38 = vld [vmem:[#allocation7 + $0xa8] sm:$0xff]  ;;  %v217_v39 = vld [vmem:[#allocation7 + $0x80] sm:$0xff]  ;;  %1203 = vmatpush1.bf16.msra.mxu0 %v1202_v25  ;;  %v1206_v41 = vpack.c.bf16 %v349_v36, %v345_v35  ;;  %1331 = vmatpush1.bf16.msra.mxu1 %v1330_v33 }
  0x68   :  { %v221_v40 = vld [vmem:[#allocation7 + $0xa0] sm:$0xff]  ;;  %v1332_v42 = vpack.c.bf16 %v222_v38, %v218_v37  ;;  %v354_v43 = vld [vmem:[#allocation8 + $0xc8] sm:$0xff]  ;;  %1205 = vmatprep.subr.bf16.mxu0 %v1204_v34 }
  0x69   :  { %v358_v44 = vld [vmem:[#allocation8 + $0xe8] sm:$0xff]  ;;  %v353_v45 = vld [vmem:[#allocation8 + $0xc0] sm:$0xff]  ;;  %v1334_v46 = vpack.c.bf16 %v221_v40, %v217_v39 }
  0x6a   :  { %v1208_v47 = vpack.c.bf16 %v358_v44, %v354_v43  ;;  %v357_v48 = vld [vmem:[#allocation8 + $0xe0] sm:$0xff]  ;;  %v226_v49 = vld [vmem:[#allocation7 + $0xc8] sm:$0xff]  ;;  %1333 = vmatprep.subr.bf16.mxu1 %v1332_v42 }
  0x6b   :  { %v230_v50 = vld [vmem:[#allocation7 + $0xe8] sm:$0xff]  ;;  %v225_v52 = vld [vmem:[#allocation7 + $0xc0] sm:$0xff]  ;;  %1207 = vmatpush1.bf16.msra.mxu0 %v1206_v41  ;;  %v1210_v56 = vpack.c.bf16 %v357_v48, %v353_v45  ;;  %1335 = vmatpush1.bf16.msra.mxu1 %v1334_v46 }
  0x6c   :  { %v1336_v51 = vpack.c.bf16 %v230_v50, %v226_v49  ;;  %v229_v53 = vld [vmem:[#allocation7 + $0xe0] sm:$0xff]  ;;  %v362_v54 = vld [vmem:[#allocation8 + $0x108] sm:$0xff]  ;;  %1209 = vmatprep.subr.bf16.mxu0 %v1208_v47 }
  0x6d   :  { %v366_v55 = vld [vmem:[#allocation8 + $0x128] sm:$0xff]  ;;  %v1338_v59 = vpack.c.bf16 %v229_v53, %v225_v52  ;;  %v361_v61 = vld [vmem:[#allocation8 + $0x100] sm:$0xff] }
  0x6e   :  { %v234_v57 = vld [vmem:[#allocation7 + $0x108] sm:$0xff]  ;;  %v1212_v60 = vpack.c.bf16 %v366_v55, %v362_v54  ;;  %v365_v62 = vld [vmem:[#allocation8 + $0x120] sm:$0xff]  ;;  %1337 = vmatprep.subr.bf16.mxu1 %v1336_v51 }
  0x6f   :  { %v238_v58 = vld [vmem:[#allocation7 + $0x128] sm:$0xff]  ;;  %v233_v63 = vld [vmem:[#allocation7 + $0x100] sm:$0xff]  ;;  %1211 = vmatpush1.bf16.msra.mxu0 %v1210_v56  ;;  %v1214_v6 = vpack.c.bf16 %v365_v62, %v361_v61  ;;  %1339 = vmatpush1.bf16.msra.mxu1 %v1338_v59 }
  0x70   :  { %v1340_v0 = vpack.c.bf16 %v238_v58, %v234_v57  ;;  %v237_v1 = vld [vmem:[#allocation7 + $0x120] sm:$0xff]  ;;  %v370_v2 = vld [vmem:[#allocation8 + $0x148] sm:$0xff]  ;;  %1213 = vmatprep.subr.bf16.mxu0 %v1212_v60 }
  0x71   :  { %v374_v3 = vld [vmem:[#allocation8 + $0x168] sm:$0xff]  ;;  %v1342_v7 = vpack.c.bf16 %v237_v1, %v233_v63  ;;  %v369_v9 = vld [vmem:[#allocation8 + $0x140] sm:$0xff] }
  0x72   :  { %v242_v4 = vld [vmem:[#allocation7 + $0x148] sm:$0xff]  ;;  %v1216_v8 = vpack.c.bf16 %v374_v3, %v370_v2  ;;  %v373_v10 = vld [vmem:[#allocation8 + $0x160] sm:$0xff]  ;;  %1341 = vmatprep.subr.bf16.mxu1 %v1340_v0 }
  0x73   :  { %v246_v5 = vld [vmem:[#allocation7 + $0x168] sm:$0xff]  ;;  %v241_v11 = vld [vmem:[#allocation7 + $0x140] sm:$0xff]  ;;  %1215 = vmatpush1.bf16.msra.mxu0 %v1214_v6  ;;  %v1218_v18 = vpack.c.bf16 %v373_v10, %v369_v9  ;;  %1343 = vmatpush1.bf16.msra.mxu1 %v1342_v7 }
  0x74   :  { %v1344_v12 = vpack.c.bf16 %v246_v5, %v242_v4  ;;  %v245_v13 = vld [vmem:[#allocation7 + $0x160] sm:$0xff]  ;;  %v378_v14 = vld [vmem:[#allocation8 + $0x188] sm:$0xff]  ;;  %1217 = vmatprep.subr.bf16.mxu0 %v1216_v8 }
  0x75   :  { %v382_v15 = vld [vmem:[#allocation8 + $0x1a8] sm:$0xff]  ;;  %v1346_v19 = vpack.c.bf16 %v245_v13, %v241_v11  ;;  %v377_v21 = vld [vmem:[#allocation8 + $0x180] sm:$0xff] }
  0x76   :  { %v250_v16 = vld [vmem:[#allocation7 + $0x188] sm:$0xff]  ;;  %v1220_v20 = vpack.c.bf16 %v382_v15, %v378_v14  ;;  %v381_v22 = vld [vmem:[#allocation8 + $0x1a0] sm:$0xff]  ;;  %1345 = vmatprep.subr.bf16.mxu1 %v1344_v12 }
  0x77   :  { %v254_v17 = vld [vmem:[#allocation7 + $0x1a8] sm:$0xff]  ;;  %v249_v23 = vld [vmem:[#allocation7 + $0x180] sm:$0xff]  ;;  %1219 = vmatpush1.bf16.msra.mxu0 %v1218_v18  ;;  %v1222_v30 = vpack.c.bf16 %v381_v22, %v377_v21  ;;  %1347 = vmatpush1.bf16.msra.mxu1 %v1346_v19 }
  0x78   :  { %v1348_v24 = vpack.c.bf16 %v254_v17, %v250_v16  ;;  %v253_v25 = vld [vmem:[#allocation7 + $0x1a0] sm:$0xff]  ;;  %v386_v26 = vld [vmem:[#allocation8 + $0x1c8] sm:$0xff]  ;;  %1221 = vmatprep.subr.bf16.mxu0 %v1220_v20 }
  0x79   :  { %v390_v27 = vld [vmem:[#allocation8 + $0x1e8] sm:$0xff]  ;;  %v1350_v31 = vpack.c.bf16 %v253_v25, %v249_v23  ;;  %v385_v33 = vld [vmem:[#allocation8 + $0x1c0] sm:$0xff] }
  0x7a   :  { %v258_v28 = vld [vmem:[#allocation7 + $0x1c8] sm:$0xff]  ;;  %v1224_v32 = vpack.c.bf16 %v390_v27, %v386_v26  ;;  %v389_v34 = vld [vmem:[#allocation8 + $0x1e0] sm:$0xff]  ;;  %1349 = vmatprep.subr.bf16.mxu1 %v1348_v24 }
  0x7b   :  { %v262_v29 = vld [vmem:[#allocation7 + $0x1e8] sm:$0xff]  ;;  %v257_v35 = vld [vmem:[#allocation7 + $0x1c0] sm:$0xff]  ;;  %1223 = vmatpush1.bf16.msra.mxu0 %v1222_v30  ;;  %v1226_v42 = vpack.c.bf16 %v389_v34, %v385_v33  ;;  %1351 = vmatpush1.bf16.msra.mxu1 %v1350_v31 }
  0x7c   :  { %v1352_v36 = vpack.c.bf16 %v262_v29, %v258_v28  ;;  %v261_v37 = vld [vmem:[#allocation7 + $0x1e0] sm:$0xff]  ;;  %v394_v38 = vld [vmem:[#allocation8 + $0x208] sm:$0xff]  ;;  %1225 = vmatprep.subr.bf16.mxu0 %v1224_v32 }
  0x7d   :  { %v398_v39 = vld [vmem:[#allocation8 + $0x228] sm:$0xff]  ;;  %v1354_v43 = vpack.c.bf16 %v261_v37, %v257_v35  ;;  %v393_v45 = vld [vmem:[#allocation8 + $0x200] sm:$0xff] }
  0x7e   :  { %v266_v40 = vld [vmem:[#allocation7 + $0x208] sm:$0xff]  ;;  %v1228_v44 = vpack.c.bf16 %v398_v39, %v394_v38  ;;  %v397_v46 = vld [vmem:[#allocation8 + $0x220] sm:$0xff]  ;;  %1353 = vmatprep.subr.bf16.mxu1 %v1352_v36 }
  0x7f   :  { %v270_v41 = vld [vmem:[#allocation7 + $0x228] sm:$0xff]  ;;  %v265_v48 = vld [vmem:[#allocation7 + $0x200] sm:$0xff]  ;;  %1227 = vmatpush1.bf16.msra.mxu0 %v1226_v42  ;;  %v1230_v50 = vpack.c.bf16 %v397_v46, %v393_v45  ;;  %1355 = vmatpush1.bf16.msra.mxu1 %v1354_v43 }
  0x80   :  { %v1356_v47 = vpack.c.bf16 %v270_v41, %v266_v40  ;;  %v269_v49 = vld [vmem:[#allocation7 + $0x220] sm:$0xff]  ;;  %1229 = vmatprep.subr.bf16.mxu0 %v1228_v44  ;;  %v402_v59 = vld [vmem:[#allocation8 + $0x248] sm:$0xff] }
  0x81   :  { %v1358_v51 = vpack.c.bf16 %v269_v49, %v265_v48  ;;  %v406_v60 = vld [vmem:[#allocation8 + $0x268] sm:$0xff]  ;;  %v401_v62 = vld [vmem:[#allocation8 + $0x240] sm:$0xff] }
  0x82   :  { %1357 = vmatprep.subr.bf16.mxu1 %v1356_v47  ;;  %v1232_v61 = vpack.c.bf16 %v406_v60, %v402_v59  ;;  %v405_v63 = vld [vmem:[#allocation8 + $0x260] sm:$0xff]  ;;  %v274_v0 = vld [vmem:[#allocation7 + $0x248] sm:$0xff] }
  0x83   :  { %1231 = vmatpush1.bf16.msra.mxu0 %v1230_v50  ;;  %1359 = vmatpush1.bf16.msra.mxu1 %v1358_v51  ;;  %v1234_v1 = vpack.c.bf16 %v405_v63, %v401_v62  ;;  %v278_v2 = vld [vmem:[#allocation7 + $0x268] sm:$0xff]  ;;  %v273_v3 = vld [vmem:[#allocation7 + $0x240] sm:$0xff] }
  0x84   :  { %v277_v4 = vld [vmem:[#allocation7 + $0x260] sm:$0xff]  ;;  %1233 = vmatprep.subr.bf16.mxu0 %v1232_v61  ;;  %v1360_v5 = vpack.c.bf16 %v278_v2, %v274_v0  ;;  %v410_v7 = vld [vmem:[#allocation8 + $0x288] sm:$0xff] }
  0x85   :  { %v1362_v6 = vpack.c.bf16 %v277_v4, %v273_v3  ;;  %v414_v8 = vld [vmem:[#allocation8 + $0x2a8] sm:$0xff]  ;;  %v409_v10 = vld [vmem:[#allocation8 + $0x280] sm:$0xff] }
  0x86   :  { %1361 = vmatprep.subr.bf16.mxu1 %v1360_v5  ;;  %v1236_v9 = vpack.c.bf16 %v414_v8, %v410_v7  ;;  %v413_v11 = vld [vmem:[#allocation8 + $0x2a0] sm:$0xff]  ;;  %v282_v12 = vld [vmem:[#allocation7 + $0x288] sm:$0xff]  ;;  %v1770_v5 = vmov 1983009808   ;;  %v603_v7 = vlaneseq }
  0x87   :  { %1235 = vmatpush1.bf16.msra.mxu0 %v1234_v1  ;;  %1363 = vmatpush1.bf16.msra.mxu1 %v1362_v6  ;;  %v1238_v13 = vpack.c.bf16 %v413_v11, %v409_v10  ;;  %v286_v14 = vld [vmem:[#allocation7 + $0x2a8] sm:$0xff]  ;;  %v281_v15 = vld [vmem:[#allocation7 + $0x280] sm:$0xff]  ;;  %v601_v6 = vunpack.c.l.s4 %v1770_v5  ;;  %v364_v5 = vld [vmem:[#allocation8 + $0x118] sm:$0xff] }
  0x88   :  { %v285_v16 = vld [vmem:[#allocation7 + $0x2a0] sm:$0xff]  ;;  %1237 = vmatprep.subr.bf16.mxu0 %v1236_v9  ;;  %v1364_v17 = vpack.c.bf16 %v286_v14, %v282_v12  ;;  %v418_v19 = vld [vmem:[#allocation8 + $0x2c8] sm:$0xff] }
  0x89   :  { %v1366_v18 = vpack.c.bf16 %v285_v16, %v281_v15  ;;  %v422_v20 = vld [vmem:[#allocation8 + $0x2e8] sm:$0xff]  ;;  %v417_v22 = vld [vmem:[#allocation8 + $0x2c0] sm:$0xff]  ;;  %v602_v16 = vunpack.c.0.s8 %v601_v6  ;;  %v368_v6 = vld [vmem:[#allocation8 + $0x138] sm:$0xff] }
  0x8a   :  { %1365 = vmatprep.subr.bf16.mxu1 %v1364_v17  ;;  %v1240_v21 = vpack.c.bf16 %v422_v20, %v418_v19  ;;  %v421_v23 = vld [vmem:[#allocation8 + $0x2e0] sm:$0xff]  ;;  %v290_v24 = vld [vmem:[#allocation7 + $0x2c8] sm:$0xff]  ;;  %v1903_v17 = vshrl.u32 %v603_v7, 7 }
  0x8b   :  { %1239 = vmatpush1.bf16.msra.mxu0 %v1238_v13  ;;  %1367 = vmatpush1.bf16.msra.mxu1 %v1366_v18  ;;  %v1242_v25 = vpack.c.bf16 %v421_v23, %v417_v22  ;;  %v294_v26 = vld [vmem:[#allocation7 + $0x2e8] sm:$0xff]  ;;  %v289_v27 = vld [vmem:[#allocation7 + $0x2c0] sm:$0xff]  ;;  %v1908_v23 = vld.sshfl [vmem:[#allocation2] sm:$0x33 pattern:$0x76325410] }
  0x8c   :  { %v293_v28 = vld [vmem:[#allocation7 + $0x2e0] sm:$0xff]  ;;  %1241 = vmatprep.subr.bf16.mxu0 %v1240_v21  ;;  %v1368_v29 = vpack.c.bf16 %v294_v26, %v290_v24  ;;  %v426_v31 = vld [vmem:[#allocation8 + $0x308] sm:$0xff]  ;;  %v1906_v21 = vsub.s32 %v602_v16, %v1903_v17  ;;  %v332_v24 = vld [vmem:[#allocation8 + $0x18] sm:$0xff] }
  0x8d   :  { %v1370_v30 = vpack.c.bf16 %v293_v28, %v289_v27  ;;  %v430_v32 = vld [vmem:[#allocation8 + $0x328] sm:$0xff]  ;;  %v425_v34 = vld [vmem:[#allocation8 + $0x300] sm:$0xff]  ;;  %v1912_v27 = vcombine.high %v1908_v23, %v1908_v23  ;;  %v375_v16 = vld [vmem:[#allocation8 + $0x170] sm:$0xff] }
  0x8e   :  { %1369 = vmatprep.subr.bf16.mxu1 %v1368_v29  ;;  %v1244_v33 = vpack.c.bf16 %v430_v32, %v426_v31  ;;  %v429_v35 = vld [vmem:[#allocation8 + $0x320] sm:$0xff]  ;;  %v298_v36 = vld [vmem:[#allocation7 + $0x308] sm:$0xff] }
  0x8f   :  { %1243 = vmatpush1.bf16.msra.mxu0 %v1242_v25  ;;  %1371 = vmatpush1.bf16.msra.mxu1 %v1370_v30  ;;  %v1246_v37 = vpack.c.bf16 %v429_v35, %v425_v34  ;;  %v302_v38 = vld [vmem:[#allocation7 + $0x328] sm:$0xff]  ;;  %v297_v39 = vld [vmem:[#allocation7 + $0x300] sm:$0xff]  ;;  %v336_v25 = vld [vmem:[#allocation8 + $0x38] sm:$0xff] }
  0x90   :  { %v301_v40 = vld [vmem:[#allocation7 + $0x320] sm:$0xff]  ;;  %1245 = vmatprep.subr.bf16.mxu0 %v1244_v33  ;;  %v1372_v41 = vpack.c.bf16 %v302_v38, %v298_v36  ;;  %v434_v43 = vld [vmem:[#allocation8 + $0x348] sm:$0xff]  ;;  %v1260_v26 = vpack.c.bf16 %v336_v25, %v332_v24  ;;  %674 = vmatprep.mubr.f32.mxu1 %v1912_v27  ;;  %v331_v34 = vld [vmem:[#allocation8 + $0x10] sm:$0xff] }
  0x91   :  { %v1374_v42 = vpack.c.bf16 %v301_v40, %v297_v39  ;;  %v438_v44 = vld [vmem:[#allocation8 + $0x368] sm:$0xff]  ;;  %v433_v46 = vld [vmem:[#allocation8 + $0x340] sm:$0xff]  ;;  %v335_v35 = vld [vmem:[#allocation8 + $0x30] sm:$0xff] }
  0x92   :  { %1373 = vmatprep.subr.bf16.mxu1 %v1372_v41  ;;  %v1248_v45 = vpack.c.bf16 %v438_v44, %v434_v43  ;;  %v437_v47 = vld [vmem:[#allocation8 + $0x360] sm:$0xff]  ;;  %v306_v48 = vld [vmem:[#allocation7 + $0x348] sm:$0xff]  ;;  %v340_v36 = vld [vmem:[#allocation8 + $0x58] sm:$0xff]  ;;  %v1262_v41 = vpack.c.bf16 %v335_v35, %v331_v34 }
  0x93   :  { %1247 = vmatpush1.bf16.msra.mxu0 %v1246_v37  ;;  %1375 = vmatpush1.bf16.msra.mxu1 %v1374_v42  ;;  %v1250_v49 = vpack.c.bf16 %v437_v47, %v433_v46  ;;  %v310_v50 = vld [vmem:[#allocation7 + $0x368] sm:$0xff]  ;;  %v305_v51 = vld [vmem:[#allocation7 + $0x340] sm:$0xff]  ;;  %v344_v37 = vld [vmem:[#allocation8 + $0x78] sm:$0xff] }
  0x94   :  { %1249 = vmatprep.subr.bf16.mxu0 %v1248_v45  ;;  %v441_v59 = vld [vmem:[#allocation8 + $0x380] sm:$0xff]  ;;  %v314_v62 = vld [vmem:[#allocation7 + $0x388] sm:$0xff]  ;;  %v1264_v42 = vpack.c.bf16 %v344_v37, %v340_v36  ;;  %v339_v43 = vld [vmem:[#allocation8 + $0x50] sm:$0xff] }
  0x95   :  { %v445_v61 = vld [vmem:[#allocation8 + $0x3a0] sm:$0xff]  ;;  %v318_v63 = vld [vmem:[#allocation7 + $0x3a8] sm:$0xff]  ;;  %v343_v44 = vld [vmem:[#allocation8 + $0x70] sm:$0xff] }
  0x96   :  { %v1254_v0 = vpack.c.bf16 %v445_v61, %v441_v59  ;;  %v1380_v1 = vpack.c.bf16 %v318_v63, %v314_v62  ;;  %v313_v2 = vld [vmem:[#allocation7 + $0x380] sm:$0xff]  ;;  %v450_v4 = vld [vmem:[#allocation8 + $0x3c8] sm:$0xff]  ;;  %v348_v45 = vld [vmem:[#allocation8 + $0x98] sm:$0xff] }
  0x97   :  { %1251 = vmatpush1.bf16.msra.mxu0 %v1250_v49  ;;  %v317_v3 = vld [vmem:[#allocation7 + $0x3a0] sm:$0xff]  ;;  %v454_v9 = vld [vmem:[#allocation8 + $0x3e8] sm:$0xff]  ;;  %v352_v46 = vld [vmem:[#allocation8 + $0xb8] sm:$0xff] }
  0x98   :  { %v1382_v8 = vpack.c.bf16 %v317_v3, %v313_v2  ;;  %v449_v10 = vld [vmem:[#allocation8 + $0x3c0] sm:$0xff]  ;;  %v1256_v12 = vpack.c.bf16 %v454_v9, %v450_v4  ;;  %v322_v13 = vld [vmem:[#allocation7 + $0x3c8] sm:$0xff]  ;;  %v347_v47 = vld [vmem:[#allocation8 + $0x90] sm:$0xff] }
  0x99   :  { %v453_v11 = vld [vmem:[#allocation8 + $0x3e0] sm:$0xff]  ;;  %v326_v14 = vld [vmem:[#allocation7 + $0x3e8] sm:$0xff]  ;;  %v870_v49 = vld [vmem:[#allocation10 + $0x18] sm:$0xff] }
  0x9a   :  { %v321_v15 = vld [vmem:[#allocation7 + $0x3c0] sm:$0xff]  ;;  %v1258_v18 = vpack.c.bf16 %v453_v11, %v449_v10  ;;  %v1384_v19 = vpack.c.bf16 %v326_v14, %v322_v13  ;;  %v873_v61 = vld [vmem:[#allocation10 + $0x30] sm:$0xff]  ;;  %v356_v62 = vld [vmem:[#allocation8 + $0xd8] sm:$0xff] }
  0x9b   :  { %v325_v20 = vld [vmem:[#allocation7 + $0x3e0] sm:$0xff]  ;;  %v360_v63 = vld [vmem:[#allocation8 + $0xf8] sm:$0xff]  ;;  %v355_v3 = vld [vmem:[#allocation8 + $0xd0] sm:$0xff] }
  0x9c   :  { %v1386_v22 = vpack.c.bf16 %v325_v20, %v321_v15  ;;  %v1272_v2 = vpack.c.bf16 %v360_v63, %v356_v62  ;;  %v359_v4 = vld [vmem:[#allocation8 + $0xf0] sm:$0xff]  ;;  %v372_v11 = vld [vmem:[#allocation8 + $0x158] sm:$0xff] }
  0x9d   :  { %v1274_v7 = vpack.c.bf16 %v359_v4, %v355_v3  ;;  %v363_v9 = vld [vmem:[#allocation8 + $0x110] sm:$0xff]  ;;  %v400_v34 = vld [vmem:[#allocation8 + $0x238] sm:$0xff] }
  0x9e   :  { %v367_v10 = vld [vmem:[#allocation8 + $0x130] sm:$0xff] }
  0x9f   :  { %v1278_v13 = vpack.c.bf16 %v367_v10, %v363_v9  ;;  %v371_v15 = vld [vmem:[#allocation8 + $0x150] sm:$0xff] }
  0xa0   :  { %v1282_v20 = vpack.c.bf16 %v375_v16, %v371_v15  ;;  %v379_v24 = vld [vmem:[#allocation8 + $0x190] sm:$0xff] }
  0xa1   :  { %v383_v25 = vld [vmem:[#allocation8 + $0x1b0] sm:$0xff] }
  0xa2   :  { %v395_v37 = vld [vmem:[#allocation8 + $0x210] sm:$0xff] }
  0xa3   :  { %v427_v62 = vld [vmem:[#allocation8 + $0x310] sm:$0xff] }
  0xa4   :  { %v431_v63 = vld [vmem:[#allocation8 + $0x330] sm:$0xff] }
  0xa5   :  { %v435_v4 = vld [vmem:[#allocation8 + $0x350] sm:$0xff] }
  0xa6   :  { %v443_v10 = vld [vmem:[#allocation8 + $0x390] sm:$0xff] }
  0xa7   :  { %v451_v16 = vld [vmem:[#allocation8 + $0x3d0] sm:$0xff] }
 0x135   :  { %v1893_v52 = vpop.f32.mrb[0].mxu0 }
 0x136   :  { %v184_v53 = vmul.f32 %v1893_v52, %v1893_v52  ;;  %v1897_v54 = vpop.f32.mrb[1].mxu0 }
 0x137   :  { %v185_v55 = vmul.f32 %v1897_v54, %v1897_v54 }
 0x138   :  { %v186_v56 = vsel %vm106_vm0, %v184_v53, 0.0  ;;  %v309_v53 = vld [vmem:[#allocation7 + $0x360] sm:$0xff] }
 0x139   :  { %v187_v57 = vsel %vm106_vm0, %v185_v55, 0.0  ;;  %v1376_v55 = vpack.c.bf16 %v310_v50, %v306_v48  ;;  %v868_v48 = vld [vmem:[#allocation10 + $0x8] sm:$0xff]  ;;  %v867_v50 = vld [vmem:[#allocation10] sm:$0xff] }
 0x13a   :  { %v188_v58 = vadd.f32 %v187_v57, %v186_v56  ;;  %v1378_v56 = vpack.c.bf16 %v309_v53, %v305_v51  ;;  %v442_v57 = vld [vmem:[#allocation8 + $0x388] sm:$0xff]  ;;  %v1266_v51 = vpack.c.bf16 %v343_v44, %v339_v43  ;;  %v869_v53 = vld [vmem:[#allocation10 + $0x10] sm:$0xff] }
 0x13b   :  { %1377 = vmatprep.subr.bf16.mxu1 %v1376_v55  ;;  %v874_v55 = vld [vmem:[#allocation10 + $0x38] sm:$0xff]  ;;  %v403_v44 = vld [vmem:[#allocation8 + $0x250] sm:$0xff] }
 0x13c   :  { %189 = vadd.xlane.f32.xlu0 %v188_v58  ;;  %v446_v58 = vld [vmem:[#allocation8 + $0x3a8] sm:$0xff]  ;;  %1379 = vmatpush1.bf16.msra.mxu1 %v1378_v56  ;;  %v1268_v56 = vpack.c.bf16 %v352_v46, %v348_v45  ;;  %v407_v45 = vld [vmem:[#allocation8 + $0x270] sm:$0xff]  ;;  %v412_v46 = vld [vmem:[#allocation8 + $0x298] sm:$0xff] }
 0x13d   :  { %v1252_v60 = vpack.c.bf16 %v446_v58, %v442_v57  ;;  %1381 = vmatprep.subr.bf16.mxu1 %v1380_v1  ;;  %v351_v57 = vld [vmem:[#allocation8 + $0xb0] sm:$0xff]  ;;  %v1454_v58 = vpack.c.bf16 %v869_v53, %v867_v50  ;;  %v424_v53 = vld [vmem:[#allocation8 + $0x2f8] sm:$0xff] }
 0x13e   :  { %v1270_v1 = vpack.c.bf16 %v351_v57, %v347_v47  ;;  %v416_v47 = vld [vmem:[#allocation8 + $0x2b8] sm:$0xff]  ;;  %v411_v50 = vld [vmem:[#allocation8 + $0x290] sm:$0xff] }
 0x13f   :  { %1253 = vmatprep.subr.bf16.mxu0 %v1252_v60  ;;  %v871_v60 = vld [vmem:[#allocation10 + $0x20] sm:$0xff]  ;;  %v423_v57 = vld [vmem:[#allocation8 + $0x2f0] sm:$0xff] }
 0x140   :  { %1255 = vmatpush1.bf16.msra.mxu0 %v1254_v0  ;;  %1383 = vmatpush1.bf16.msra.mxu1 %v1382_v8  ;;  %v1458_v0 = vpack.c.bf16 %v873_v61, %v871_v60  ;;  %v1276_v8 = vpack.c.bf16 %v368_v6, %v364_v5  ;;  %v439_v5 = vld [vmem:[#allocation8 + $0x370] sm:$0xff]  ;;  %v444_v6 = vld [vmem:[#allocation8 + $0x398] sm:$0xff] }
 0x141   :  { %1257 = vmatprep.subr.bf16.mxu0 %v1256_v12  ;;  %1385 = vmatprep.subr.bf16.mxu1 %v1384_v19  ;;  %v376_v12 = vld [vmem:[#allocation8 + $0x178] sm:$0xff] }
 0x142   :  { %v1280_v14 = vpack.c.bf16 %v376_v12, %v372_v11  ;;  %v384_v19 = vld [vmem:[#allocation8 + $0x1b8] sm:$0xff]  ;;  %v447_v11 = vld [vmem:[#allocation8 + $0x3b0] sm:$0xff] }
 0x143   :  { %v452_v12 = vld [vmem:[#allocation8 + $0x3d8] sm:$0xff] }
 0x144   :  { %1259 = vmatpush1.bf16.msra.mxu0 %v1258_v18  ;;  %1387 = vmatpush1.bf16.msra.mxu1 %v1386_v22  ;;  %v380_v18 = vld [vmem:[#allocation8 + $0x198] sm:$0xff] }
 0x145   :  { %1261 = vmatprep.subr.bf16.mxu0 %v1260_v26  ;;  %v1284_v22 = vpack.c.bf16 %v384_v19, %v380_v18  ;;  %v388_v26 = vld [vmem:[#allocation8 + $0x1d8] sm:$0xff]  ;;  %v455_v18 = vld [vmem:[#allocation8 + $0x3f0] sm:$0xff] }
 0x146   :  { %v204_v19 = vld [vmem:[#allocation7 + $0x18] sm:$0xff] }
 0x147   :  { %675 = vmatmul.mubr.f32.vlgmr.msra.gmra.mrb[0].mxu1 %v1908_v23 }
 0x1c9   :  { %v190_v28 = vpop.xlane.xlu0 %189 }
 0x1ca   :  { %1601 = vrsqrt.f32 %v190_v28  ;;  %vm193_vm4 = vcmp.eq.f32.partialorder %v190_v28, inf  ;;  %v196_v31 = vand.u32 2147483648, %v190_v28  ;;  %vm195_vm5 = vcmp.eq.f32.partialorder %v190_v28, 0.0 }
 0x1d4   :  { %v1602_v29 = vpop.eup %1601 }
 0x1d5   :  { %v192_v30 = vmul.f32 %v1602_v29, %v190_v28  ;;  %v1286_v29 = vpack.c.bf16 %v383_v25, %v379_v24  ;;  %v203_v25 = vld [vmem:[#allocation7 + $0x10] sm:$0xff] }
 0x1d7   :  { %v194_v32 = vsel %vm193_vm4, %v190_v28, %v192_v30  ;;  %v392_v28 = vld [vmem:[#allocation8 + $0x1f8] sm:$0xff] }
 0x1d8   :  { %v197_v33 = vsel %vm195_vm5, %v196_v31, %v194_v32  ;;  %v1288_v30 = vpack.c.bf16 %v392_v28, %v388_v26  ;;  %v387_v31 = vld [vmem:[#allocation8 + $0x1d0] sm:$0xff]  ;;  %v212_v28 = vld [vmem:[#allocation7 + $0x58] sm:$0xff] }
 0x1d9   :  { %1603 = vrcp.f32 %v197_v33  ;;  %v391_v32 = vld [vmem:[#allocation8 + $0x1f0] sm:$0xff]  ;;  %v396_v33 = vld [vmem:[#allocation8 + $0x218] sm:$0xff] }
 0x1da   :  { %v1290_v35 = vpack.c.bf16 %v391_v32, %v387_v31  ;;  %v1292_v36 = vpack.c.bf16 %v400_v34, %v396_v33  ;;  %v207_v26 = vld [vmem:[#allocation7 + $0x30] sm:$0xff]  ;;  %v220_v34 = vld [vmem:[#allocation7 + $0x98] sm:$0xff] }
 0x1db   :  { %v211_v32 = vld [vmem:[#allocation7 + $0x50] sm:$0xff] }
 0x1dc   :  { %v215_v33 = vld [vmem:[#allocation7 + $0x70] sm:$0xff] }
 0x1e3   :  { %v1604_v38 = vpop.eup %1603 }
 0x1e4   :  { %v200_v39 = vmul.f32 %v1604_v38, %v1897_v54  ;;  %v1918_v40 = vmul.f32 %v1604_v38, %v1893_v52  ;;  %v1452_v54 = vpack.c.bf16 %v870_v49, %v868_v48  ;;  %v872_v52 = vld [vmem:[#allocation10 + $0x28] sm:$0xff]  ;;  %v399_v38 = vld [vmem:[#allocation8 + $0x230] sm:$0xff]  ;;  %v1298_v48 = vpack.c.bf16 %v407_v45, %v403_v44 }
 0x1e5   :  { %v1456_v59 = vpack.c.bf16 %v874_v55, %v872_v52  ;;  %v1300_v49 = vpack.c.bf16 %v416_v47, %v412_v46  ;;  %v227_v45 = vld [vmem:[#allocation7 + $0xd0] sm:$0xff]  ;;  %v236_v47 = vld [vmem:[#allocation7 + $0x118] sm:$0xff] }
 0x1e6   :  { %521 = vmatprep.mubr.f32.mxu0 %v200_v39  ;;  %1453 = vmatprep.subr.bf16.mxu1 %v1452_v54  ;;  %v420_v54 = vld [vmem:[#allocation8 + $0x2d8] sm:$0xff]  ;;  %v231_v46 = vld [vmem:[#allocation7 + $0xf0] sm:$0xff] }
 0x1e7   :  { %522 = vmatmul.mubr.f32.vlgmr.msra.gmra.mrb[2].mxu0 %v1918_v40  ;;  %1455 = vmatpush1.bf16.msra.mxu1 %v1454_v58  ;;  %v1304_v55 = vpack.c.bf16 %v424_v53, %v420_v54  ;;  %v428_v58 = vld [vmem:[#allocation8 + $0x318] sm:$0xff] }
 0x1e8   :  { %1263 = vmatpush1.bf16.msra.mxu0 %v1262_v41  ;;  %592 = vmatprep.mubr.f32.mxu0 %v200_v39  ;;  %v404_v39 = vld [vmem:[#allocation8 + $0x258] sm:$0xff] }
 0x1e9   :  { %1265 = vmatprep.subr.bf16.mxu0 %v1264_v42  ;;  %1457 = vmatprep.subr.bf16.mxu1 %v1456_v59  ;;  %v408_v41 = vld [vmem:[#allocation8 + $0x278] sm:$0xff]  ;;  %v1294_v42 = vpack.c.bf16 %v399_v38, %v395_v37  ;;  %v219_v38 = vld [vmem:[#allocation7 + $0x90] sm:$0xff] }
 0x1ea   :  { %v1296_v43 = vpack.c.bf16 %v408_v41, %v404_v39  ;;  %v432_v59 = vld [vmem:[#allocation8 + $0x338] sm:$0xff]  ;;  %v223_v39 = vld [vmem:[#allocation7 + $0xb0] sm:$0xff] }
 0x1eb   :  { %1459 = vmatpush1.bf16.msra.mxu1 %v1458_v0  ;;  %v1308_v61 = vpack.c.bf16 %v432_v59, %v428_v58  ;;  %v436_v0 = vld [vmem:[#allocation8 + $0x358] sm:$0xff] }
 0x1ec   :  { %1267 = vmatpush1.bf16.msra.mxu0 %v1266_v51  ;;  %v415_v51 = vld [vmem:[#allocation8 + $0x2b0] sm:$0xff]  ;;  %v228_v41 = vld [vmem:[#allocation7 + $0xd8] sm:$0xff] }
 0x1ed   :  { %1269 = vmatprep.subr.bf16.mxu0 %v1268_v56  ;;  %v1302_v52 = vpack.c.bf16 %v415_v51, %v411_v50  ;;  %v419_v56 = vld [vmem:[#allocation8 + $0x2d0] sm:$0xff]  ;;  %v244_v51 = vld [vmem:[#allocation7 + $0x158] sm:$0xff] }
 0x1ee   :  { %v1306_v60 = vpack.c.bf16 %v423_v57, %v419_v56  ;;  %v235_v50 = vld [vmem:[#allocation7 + $0x110] sm:$0xff]  ;;  %v248_v54 = vld [vmem:[#allocation7 + $0x178] sm:$0xff] }
 0x1ef   :  { %v247_v56 = vld [vmem:[#allocation7 + $0x170] sm:$0xff]  ;;  %v252_v57 = vld [vmem:[#allocation7 + $0x198] sm:$0xff] }
 0x1f0   :  { %1271 = vmatpush1.bf16.msra.mxu0 %v1270_v1  ;;  %v440_v1 = vld [vmem:[#allocation8 + $0x378] sm:$0xff] }
 0x1f1   :  { %1273 = vmatprep.subr.bf16.mxu0 %v1272_v2  ;;  %v1310_v2 = vpack.c.bf16 %v431_v63, %v427_v62  ;;  %v1312_v3 = vpack.c.bf16 %v440_v1, %v436_v0  ;;  %v256_v58 = vld [vmem:[#allocation7 + $0x1b8] sm:$0xff]  ;;  %v255_v62 = vld [vmem:[#allocation7 + $0x1b0] sm:$0xff]  ;;  %v876_v1 = vld [vmem:[#allocation10 + $0x48] sm:$0xff] }
 0x1f2   :  { %v260_v63 = vld [vmem:[#allocation7 + $0x1d8] sm:$0xff] }
 0x1f3   :  { %v264_v0 = vld [vmem:[#allocation7 + $0x1f8] sm:$0xff] }
 0x1f4   :  { %1275 = vmatpush1.bf16.msra.mxu0 %v1274_v7  ;;  %v448_v7 = vld [vmem:[#allocation8 + $0x3b8] sm:$0xff] }
 0x1f5   :  { %1277 = vmatprep.subr.bf16.mxu0 %v1276_v8  ;;  %v1314_v8 = vpack.c.bf16 %v439_v5, %v435_v4  ;;  %v1316_v9 = vpack.c.bf16 %v448_v7, %v444_v6  ;;  %v875_v5 = vld [vmem:[#allocation10 + $0x40] sm:$0xff]  ;;  %v877_v6 = vld [vmem:[#allocation10 + $0x50] sm:$0xff] }
 0x1f8   :  { %1279 = vmatpush1.bf16.msra.mxu0 %v1278_v13  ;;  %v456_v13 = vld [vmem:[#allocation8 + $0x3f8] sm:$0xff] }
 0x1f9   :  { %1281 = vmatprep.subr.bf16.mxu0 %v1280_v14  ;;  %v1318_v14 = vpack.c.bf16 %v447_v11, %v443_v10  ;;  %v1320_v15 = vpack.c.bf16 %v456_v13, %v452_v12  ;;  %v1416_v10 = vpack.c.bf16 %v264_v0, %v260_v63  ;;  %v259_v11 = vld [vmem:[#allocation7 + $0x1d0] sm:$0xff]  ;;  %v268_v13 = vld [vmem:[#allocation7 + $0x218] sm:$0xff] }
 0x1fa   :  { %v263_v12 = vld [vmem:[#allocation7 + $0x1f0] sm:$0xff]  ;;  %v300_v0 = vld [vmem:[#allocation7 + $0x318] sm:$0xff] }
 0x1fb   :  { %v295_v63 = vld [vmem:[#allocation7 + $0x2f0] sm:$0xff] }
 0x1fc   :  { %1283 = vmatpush1.bf16.msra.mxu0 %v1282_v20  ;;  %v208_v20 = vld [vmem:[#allocation7 + $0x38] sm:$0xff] }
 0x1fd   :  { %1285 = vmatprep.subr.bf16.mxu0 %v1284_v22  ;;  %v1322_v22 = vpack.c.bf16 %v455_v18, %v451_v16  ;;  %v1388_v24 = vpack.c.bf16 %v208_v20, %v204_v19  ;;  %v882_v16 = vld [vmem:[#allocation10 + $0x78] sm:$0xff]  ;;  %v879_v19 = vld [vmem:[#allocation10 + $0x60] sm:$0xff]  ;;  %v881_v20 = vld [vmem:[#allocation10 + $0x70] sm:$0xff] }
 0x200   :  { %1287 = vmatpush1.bf16.msra.mxu0 %v1286_v29  ;;  %v216_v29 = vld [vmem:[#allocation7 + $0x78] sm:$0xff] }
 0x201   :  { %1289 = vmatprep.subr.bf16.mxu0 %v1288_v30  ;;  %v1390_v30 = vpack.c.bf16 %v207_v26, %v203_v25  ;;  %v1392_v31 = vpack.c.bf16 %v216_v29, %v212_v28  ;;  %v267_v26 = vld [vmem:[#allocation7 + $0x210] sm:$0xff]  ;;  %v276_v29 = vld [vmem:[#allocation7 + $0x258] sm:$0xff] }
 0x202   :  { %v271_v28 = vld [vmem:[#allocation7 + $0x230] sm:$0xff] }
 0x204   :  { %1291 = vmatpush1.bf16.msra.mxu0 %v1290_v35  ;;  %v224_v35 = vld [vmem:[#allocation7 + $0xb8] sm:$0xff] }
 0x205   :  { %1293 = vmatprep.subr.bf16.mxu0 %v1292_v36  ;;  %v1394_v36 = vpack.c.bf16 %v215_v33, %v211_v32  ;;  %v1396_v37 = vpack.c.bf16 %v224_v35, %v220_v34  ;;  %v886_v32 = vld [vmem:[#allocation10 + $0x98] sm:$0xff]  ;;  %v883_v34 = vld [vmem:[#allocation10 + $0x80] sm:$0xff]  ;;  %v885_v35 = vld [vmem:[#allocation10 + $0x90] sm:$0xff] }
 0x208   :  { %1295 = vmatpush1.bf16.msra.mxu0 %v1294_v42  ;;  %v232_v42 = vld [vmem:[#allocation7 + $0xf8] sm:$0xff] }
 0x209   :  { %1297 = vmatprep.subr.bf16.mxu0 %v1296_v43  ;;  %v1398_v43 = vpack.c.bf16 %v223_v39, %v219_v38  ;;  %v1400_v44 = vpack.c.bf16 %v232_v42, %v228_v41  ;;  %v275_v39 = vld [vmem:[#allocation7 + $0x250] sm:$0xff]  ;;  %v284_v42 = vld [vmem:[#allocation7 + $0x298] sm:$0xff] }
 0x20a   :  { %v279_v41 = vld [vmem:[#allocation7 + $0x270] sm:$0xff] }
 0x20c   :  { %1299 = vmatpush1.bf16.msra.mxu0 %v1298_v48  ;;  %v240_v48 = vld [vmem:[#allocation7 + $0x138] sm:$0xff] }
 0x20d   :  { %1301 = vmatprep.subr.bf16.mxu0 %v1300_v49  ;;  %v1404_v49 = vpack.c.bf16 %v240_v48, %v236_v47  ;;  %v887_v47 = vld [vmem:[#allocation10 + $0xa0] sm:$0xff]  ;;  %v889_v48 = vld [vmem:[#allocation10 + $0xb0] sm:$0xff] }
 0x210   :  { %1303 = vmatpush1.bf16.msra.mxu0 %v1302_v52  ;;  %v1408_v52 = vpack.c.bf16 %v248_v54, %v244_v51  ;;  %v287_v51 = vld [vmem:[#allocation7 + $0x2b0] sm:$0xff]  ;;  %v292_v54 = vld [vmem:[#allocation7 + $0x2d8] sm:$0xff] }
 0x211   :  { %1305 = vmatprep.subr.bf16.mxu0 %v1304_v55  ;;  %v243_v55 = vld [vmem:[#allocation7 + $0x150] sm:$0xff] }
 0x212   :  { %v1410_v59 = vpack.c.bf16 %v247_v56, %v243_v55  ;;  %v894_v55 = vld [vmem:[#allocation10 + $0xd8] sm:$0xff] }
 0x214   :  { %1307 = vmatpush1.bf16.msra.mxu0 %v1306_v60  ;;  %v1412_v60 = vpack.c.bf16 %v256_v58, %v252_v57  ;;  %v891_v57 = vld [vmem:[#allocation10 + $0xc0] sm:$0xff]  ;;  %v893_v58 = vld [vmem:[#allocation10 + $0xd0] sm:$0xff] }
 0x215   :  { %1309 = vmatprep.subr.bf16.mxu0 %v1308_v61  ;;  %v251_v61 = vld [vmem:[#allocation7 + $0x190] sm:$0xff] }
 0x216   :  { %v1414_v7 = vpack.c.bf16 %v255_v62, %v251_v61  ;;  %v291_v62 = vld [vmem:[#allocation7 + $0x2d0] sm:$0xff] }
 0x218   :  { %1311 = vmatpush1.bf16.msra.mxu0 %v1310_v2  ;;  %v878_v2 = vld [vmem:[#allocation10 + $0x58] sm:$0xff] }
 0x219   :  { %1313 = vmatprep.subr.bf16.mxu0 %v1312_v3  ;;  %v1460_v4 = vpack.c.bf16 %v878_v2, %v876_v1  ;;  %v304_v1 = vld [vmem:[#allocation7 + $0x338] sm:$0xff]  ;;  %v896_v2 = vld [vmem:[#allocation10 + $0xe8] sm:$0xff] }
 0x21a   :  { %v1923_v3 = vpop.f32.mrb[0].mxu1 }
 0x21b   :  { %1461 = vmatprep.subr.bf16.mxu1 %v1460_v4  ;;  %v898_v4 = vld [vmem:[#allocation10 + $0xf8] sm:$0xff] }
 0x21c   :  { %1315 = vmatpush1.bf16.msra.mxu0 %v1314_v8  ;;  %v1925_v8 = vpop.f32.mrb[1].mxu1 }
 0x21d   :  { %1317 = vmatprep.subr.bf16.mxu0 %v1316_v9  ;;  %v1462_v9 = vpack.c.bf16 %v877_v6, %v875_v5  ;;  %v1480_v5 = vpack.c.bf16 %v898_v4, %v896_v2  ;;  %v895_v6 = vld [vmem:[#allocation10 + $0xe0] sm:$0xff]  ;;  %v920_v2 = vld [vmem:[#allocation10 + $0x1a8] sm:$0xff]  ;;  %v922_v4 = vld [vmem:[#allocation10 + $0x1b8] sm:$0xff] }
 0x21f   :  { %1463 = vmatpush1.bf16.msra.mxu1 %v1462_v9  ;;  %v1434_v9 = vpack.c.bf16 %v295_v63, %v291_v62  ;;  %v915_v63 = vld [vmem:[#allocation10 + $0x180] sm:$0xff] }
 0x220   :  { %1319 = vmatpush1.bf16.msra.mxu0 %v1318_v14  ;;  %v272_v14 = vld [vmem:[#allocation7 + $0x238] sm:$0xff] }
 0x221   :  { %1321 = vmatprep.subr.bf16.mxu0 %v1320_v15  ;;  %v880_v15 = vld [vmem:[#allocation10 + $0x68] sm:$0xff]  ;;  %v1420_v25 = vpack.c.bf16 %v272_v14, %v268_v13  ;;  %v303_v13 = vld [vmem:[#allocation7 + $0x330] sm:$0xff]  ;;  %v308_v14 = vld [vmem:[#allocation7 + $0x358] sm:$0xff] }
 0x222   :  { %v1464_v18 = vpack.c.bf16 %v882_v16, %v880_v15  ;;  %v312_v15 = vld [vmem:[#allocation7 + $0x378] sm:$0xff]  ;;  %v900_v16 = vld [vmem:[#allocation10 + $0x108] sm:$0xff] }
 0x224   :  { %1323 = vmatpush1.bf16.msra.mxu0 %v1322_v22  ;;  %v1418_v22 = vpack.c.bf16 %v263_v12, %v259_v11  ;;  %1465 = vmatprep.subr.bf16.mxu1 %v1464_v18  ;;  %v1436_v11 = vpack.c.bf16 %v304_v1, %v300_v0  ;;  %v299_v12 = vld [vmem:[#allocation7 + $0x310] sm:$0xff]  ;;  %v902_v18 = vld [vmem:[#allocation10 + $0x118] sm:$0xff] }
 0x225   :  { %1389 = vmatprep.subr.bf16.mxu0 %v1388_v24  ;;  %v1466_v24 = vpack.c.bf16 %v881_v20, %v879_v19  ;;  %v1484_v19 = vpack.c.bf16 %v902_v18, %v900_v16  ;;  %v899_v20 = vld [vmem:[#allocation10 + $0x100] sm:$0xff]  ;;  %v917_v0 = vld [vmem:[#allocation10 + $0x190] sm:$0xff]  ;;  %v928_v16 = vld [vmem:[#allocation10 + $0x1e8] sm:$0xff] }
 0x226   :  { %v1502_v1 = vpack.c.bf16 %v917_v0, %v915_v63  ;;  %v930_v18 = vld [vmem:[#allocation10 + $0x1f8] sm:$0xff] }
 0x227   :  { %593 = vmatmul.mubr.f32.vlgmr.msra.gmra.mrb[4].mxu0 %v1918_v40  ;;  %v1402_v40 = vpack.c.bf16 %v231_v46, %v227_v45  ;;  %1467 = vmatpush1.bf16.msra.mxu1 %v1466_v24  ;;  %v890_v45 = vld [vmem:[#allocation10 + $0xb8] sm:$0xff]  ;;  %v1438_v24 = vpack.c.bf16 %v303_v13, %v299_v12  ;;  %v923_v13 = vld [vmem:[#allocation10 + $0x1c0] sm:$0xff] }
 0x228   :  { %1391 = vmatpush1.bf16.msra.mxu0 %v1390_v30  ;;  %745 = vmatprep.mubr.f32.mxu0 %v1912_v27  ;;  %v239_v27 = vld [vmem:[#allocation7 + $0x130] sm:$0xff]  ;;  %v280_v30 = vld [vmem:[#allocation7 + $0x278] sm:$0xff] }
 0x229   :  { %1393 = vmatprep.subr.bf16.mxu0 %v1392_v31  ;;  %v1406_v53 = vpack.c.bf16 %v239_v27, %v235_v50  ;;  %v884_v31 = vld [vmem:[#allocation10 + $0x88] sm:$0xff]  ;;  %v1424_v38 = vpack.c.bf16 %v280_v30, %v276_v29  ;;  %v283_v27 = vld [vmem:[#allocation7 + $0x290] sm:$0xff]  ;;  %v316_v30 = vld [vmem:[#allocation7 + $0x398] sm:$0xff] }
 0x22a   :  { %v1468_v33 = vpack.c.bf16 %v886_v32, %v884_v31  ;;  %v311_v29 = vld [vmem:[#allocation7 + $0x370] sm:$0xff]  ;;  %v320_v31 = vld [vmem:[#allocation7 + $0x3b8] sm:$0xff]  ;;  %v904_v32 = vld [vmem:[#allocation10 + $0x128] sm:$0xff] }
 0x22c   :  { %1395 = vmatpush1.bf16.msra.mxu0 %v1394_v36  ;;  %v1422_v36 = vpack.c.bf16 %v271_v28, %v267_v26  ;;  %1469 = vmatprep.subr.bf16.mxu1 %v1468_v33  ;;  %v1440_v26 = vpack.c.bf16 %v312_v15, %v308_v14  ;;  %v307_v28 = vld [vmem:[#allocation7 + $0x350] sm:$0xff]  ;;  %v906_v33 = vld [vmem:[#allocation10 + $0x138] sm:$0xff] }
 0x22d   :  { %1397 = vmatprep.subr.bf16.mxu0 %v1396_v37  ;;  %v1470_v37 = vpack.c.bf16 %v885_v35, %v883_v34  ;;  %v1488_v34 = vpack.c.bf16 %v906_v33, %v904_v32  ;;  %v903_v35 = vld [vmem:[#allocation10 + $0x120] sm:$0xff]  ;;  %v925_v14 = vld [vmem:[#allocation10 + $0x1d0] sm:$0xff] }
 0x22e   :  { %v1510_v15 = vpack.c.bf16 %v925_v14, %v923_v13 }
 0x22f   :  { %1471 = vmatpush1.bf16.msra.mxu1 %v1470_v37  ;;  %v1442_v37 = vpack.c.bf16 %v311_v29, %v307_v28  ;;  %v756_v28 = vsub.s32 0, %v1903_v17  ;;  %v1932_v29 = vld [vmem:[%s1980_s5] sm:$0xf] }
 0x230   :  { %1399 = vmatpush1.bf16.msra.mxu0 %v1398_v43  ;;  %v288_v43 = vld [vmem:[#allocation7 + $0x2b8] sm:$0xff] }
 0x231   :  { %1401 = vmatprep.subr.bf16.mxu0 %v1400_v44  ;;  %v888_v44 = vld [vmem:[#allocation10 + $0xa8] sm:$0xff]  ;;  %v1428_v50 = vpack.c.bf16 %v288_v43, %v284_v42  ;;  %v319_v42 = vld [vmem:[#allocation7 + $0x3b0] sm:$0xff]  ;;  %v324_v43 = vld [vmem:[#allocation7 + $0x3d8] sm:$0xff] }
 0x232   :  { %v1472_v46 = vpack.c.bf16 %v890_v45, %v888_v44  ;;  %v328_v44 = vld [vmem:[#allocation7 + $0x3f8] sm:$0xff]  ;;  %v908_v45 = vld [vmem:[#allocation10 + $0x148] sm:$0xff] }
 0x234   :  { %1403 = vmatpush1.bf16.msra.mxu0 %v1402_v40  ;;  %v1426_v40 = vpack.c.bf16 %v279_v41, %v275_v39  ;;  %1473 = vmatprep.subr.bf16.mxu1 %v1472_v46  ;;  %v1444_v39 = vpack.c.bf16 %v320_v31, %v316_v30  ;;  %v315_v41 = vld [vmem:[#allocation7 + $0x390] sm:$0xff]  ;;  %v910_v46 = vld [vmem:[#allocation10 + $0x158] sm:$0xff]  ;;  %v760_v30 = vsub.s32 1, %v1903_v17  ;;  %v757_v31 = vrot.slane %v1932_v29, %v756_v28 }
 0x235   :  { %1405 = vmatprep.subr.bf16.mxu0 %v1404_v49  ;;  %v1474_v49 = vpack.c.bf16 %v889_v48, %v887_v47  ;;  %v1492_v47 = vpack.c.bf16 %v910_v46, %v908_v45  ;;  %v907_v48 = vld [vmem:[#allocation10 + $0x140] sm:$0xff] }
 0x236   :  { %v761_v33 = vrot.slane %v1932_v29, %v760_v30 }
 0x237   :  { %1475 = vmatpush1.bf16.msra.mxu1 %v1474_v49  ;;  %v1446_v49 = vpack.c.bf16 %v319_v42, %v315_v41 }
 0x238   :  { %1407 = vmatpush1.bf16.msra.mxu0 %v1406_v53  ;;  %v296_v53 = vld [vmem:[#allocation7 + $0x2f8] sm:$0xff] }
 0x239   :  { %1409 = vmatprep.subr.bf16.mxu0 %v1408_v52  ;;  %v892_v52 = vld [vmem:[#allocation10 + $0xc8] sm:$0xff]  ;;  %v1432_v61 = vpack.c.bf16 %v296_v53, %v292_v54  ;;  %v327_v54 = vld [vmem:[#allocation7 + $0x3f0] sm:$0xff] }
 0x23a   :  { %v1476_v56 = vpack.c.bf16 %v894_v55, %v892_v52  ;;  %v912_v53 = vld [vmem:[#allocation10 + $0x168] sm:$0xff]  ;;  %v914_v52 = vld [vmem:[#allocation10 + $0x178] sm:$0xff] }
 0x23b   :  { %v1496_v55 = vpack.c.bf16 %v914_v52, %v912_v53 }
 0x23c   :  { %1411 = vmatpush1.bf16.msra.mxu0 %v1410_v59  ;;  %v1430_v59 = vpack.c.bf16 %v287_v51, %v283_v27  ;;  %1477 = vmatprep.subr.bf16.mxu1 %v1476_v56  ;;  %v1448_v27 = vpack.c.bf16 %v328_v44, %v324_v43  ;;  %v323_v51 = vld [vmem:[#allocation7 + $0x3d0] sm:$0xff]  ;;  %v911_v56 = vld [vmem:[#allocation10 + $0x160] sm:$0xff] }
 0x23d   :  { %1413 = vmatprep.subr.bf16.mxu0 %v1412_v60  ;;  %v1478_v60 = vpack.c.bf16 %v893_v58, %v891_v57  ;;  %v913_v57 = vld [vmem:[#allocation10 + $0x170] sm:$0xff]  ;;  %v1450_v58 = vpack.c.bf16 %v327_v54, %v323_v51 }
 0x23f   :  { %1479 = vmatpush1.bf16.msra.mxu1 %v1478_v60  ;;  %v916_v60 = vld [vmem:[#allocation10 + $0x188] sm:$0xff] }
 0x240   :  { %1415 = vmatpush1.bf16.msra.mxu0 %v1414_v7  ;;  %v897_v7 = vld [vmem:[#allocation10 + $0xf0] sm:$0xff]  ;;  %1481 = vmatprep.subr.bf16.mxu1 %v1480_v5  ;;  %v1504_v5 = vpack.c.bf16 %v922_v4, %v920_v2 }
 0x241   :  { %1417 = vmatprep.subr.bf16.mxu0 %v1416_v10  ;;  %v1482_v10 = vpack.c.bf16 %v897_v7, %v895_v6  ;;  %v919_v6 = vld [vmem:[#allocation10 + $0x1a0] sm:$0xff]  ;;  %v921_v7 = vld [vmem:[#allocation10 + $0x1b0] sm:$0xff] }
 0x243   :  { %1483 = vmatpush1.bf16.msra.mxu1 %v1482_v10  ;;  %v924_v10 = vld [vmem:[#allocation10 + $0x1c8] sm:$0xff] }
 0x244   :  { %1419 = vmatpush1.bf16.msra.mxu0 %v1418_v22  ;;  %v901_v22 = vld [vmem:[#allocation10 + $0x110] sm:$0xff]  ;;  %1485 = vmatprep.subr.bf16.mxu1 %v1484_v19  ;;  %v1512_v19 = vpack.c.bf16 %v930_v18, %v928_v16 }
 0x245   :  { %1421 = vmatprep.subr.bf16.mxu0 %v1420_v25  ;;  %v1486_v25 = vpack.c.bf16 %v901_v22, %v899_v20  ;;  %v927_v20 = vld [vmem:[#allocation10 + $0x1e0] sm:$0xff]  ;;  %v929_v22 = vld [vmem:[#allocation10 + $0x1f0] sm:$0xff] }
 0x246   :  { %v933_v16 = vld [vmem:[#allocation10 + $0x210] sm:$0xff] }
 0x247   :  { %1487 = vmatpush1.bf16.msra.mxu1 %v1486_v25  ;;  %v934_v25 = vld [vmem:[#allocation10 + $0x218] sm:$0xff] }
 0x248   :  { %1423 = vmatpush1.bf16.msra.mxu0 %v1422_v36  ;;  %v905_v36 = vld [vmem:[#allocation10 + $0x130] sm:$0xff]  ;;  %1489 = vmatprep.subr.bf16.mxu1 %v1488_v34 }
 0x249   :  { %1425 = vmatprep.subr.bf16.mxu0 %v1424_v38  ;;  %v1490_v38 = vpack.c.bf16 %v905_v36, %v903_v35 }
 0x24b   :  { %1491 = vmatpush1.bf16.msra.mxu1 %v1490_v38 }
 0x24c   :  { %1427 = vmatpush1.bf16.msra.mxu0 %v1426_v40  ;;  %v909_v40 = vld [vmem:[#allocation10 + $0x150] sm:$0xff]  ;;  %1493 = vmatprep.subr.bf16.mxu1 %v1492_v47 }
 0x24d   :  { %1429 = vmatprep.subr.bf16.mxu0 %v1428_v50  ;;  %v1494_v50 = vpack.c.bf16 %v909_v40, %v907_v48 }
 0x24f   :  { %1495 = vmatpush1.bf16.msra.mxu1 %v1494_v50 }
 0x250   :  { %1431 = vmatpush1.bf16.msra.mxu0 %v1430_v59  ;;  %v1498_v59 = vpack.c.bf16 %v913_v57, %v911_v56  ;;  %1497 = vmatprep.subr.bf16.mxu1 %v1496_v55 }
 0x251   :  { %1433 = vmatprep.subr.bf16.mxu0 %v1432_v61  ;;  %v918_v61 = vld [vmem:[#allocation10 + $0x198] sm:$0xff] }
 0x252   :  { %v1500_v62 = vpack.c.bf16 %v918_v61, %v916_v60 }
 0x253   :  { %1499 = vmatpush1.bf16.msra.mxu1 %v1498_v59 }
 0x254   :  { %1435 = vmatpush1.bf16.msra.mxu0 %v1434_v9  ;;  %1501 = vmatprep.subr.bf16.mxu1 %v1500_v62  ;;  %v1506_v9 = vpack.c.bf16 %v921_v7, %v919_v6 }
 0x255   :  { %1437 = vmatprep.subr.bf16.mxu0 %v1436_v11  ;;  %v926_v11 = vld [vmem:[#allocation10 + $0x1d8] sm:$0xff] }
 0x256   :  { %v1508_v12 = vpack.c.bf16 %v926_v11, %v924_v10 }
 0x257   :  { %1503 = vmatpush1.bf16.msra.mxu1 %v1502_v1 }
 0x258   :  { %1439 = vmatpush1.bf16.msra.mxu0 %v1438_v24  ;;  %1505 = vmatprep.subr.bf16.mxu1 %v1504_v5  ;;  %v932_v24 = vld [vmem:[#allocation10 + $0x208] sm:$0xff] }
 0x259   :  { %1441 = vmatprep.subr.bf16.mxu0 %v1440_v26  ;;  %v1516_v26 = vpack.c.bf16 %v934_v25, %v932_v24 }
 0x25b   :  { %1507 = vmatpush1.bf16.msra.mxu1 %v1506_v9 }
 0x25c   :  { %1443 = vmatpush1.bf16.msra.mxu0 %v1442_v37  ;;  %1509 = vmatprep.subr.bf16.mxu1 %v1508_v12 }
 0x25d   :  { %1445 = vmatprep.subr.bf16.mxu0 %v1444_v39 }
 0x25f   :  { %1511 = vmatpush1.bf16.msra.mxu1 %v1510_v15  ;;  %v931_v15 = vld [vmem:[#allocation10 + $0x200] sm:$0xff] }
 0x260   :  { %1447 = vmatpush1.bf16.msra.mxu0 %v1446_v49  ;;  %1513 = vmatprep.subr.bf16.mxu1 %v1512_v19  ;;  %v936_v19 = vld [vmem:[#allocation10 + $0x228] sm:$0xff] }
 0x261   :  { %1449 = vmatprep.subr.bf16.mxu0 %v1448_v27 }
 0x264   :  { %1451 = vmatpush1.bf16.msra.mxu0 %v1450_v58 }
 0x267   :  { %746 = vmatmul.mubr.f32.vlgmr.msra.gmra.mrb[4].mxu0 %v1908_v23  ;;  %v1514_v23 = vpack.c.bf16 %v929_v22, %v927_v20  ;;  %v938_v20 = vld [vmem:[#allocation10 + $0x238] sm:$0xff] }
 0x268   :  { %v1520_v25 = vpack.c.bf16 %v938_v20, %v936_v19  ;;  %v971_v20 = vld [vmem:[#allocation10 + $0x340] sm:$0xff] }
 0x269   :  { %1515 = vmatpush1.bf16.msra.mxu1 %v1514_v23  ;;  %v1518_v23 = vpack.c.bf16 %v933_v16, %v931_v15  ;;  %v972_v15 = vld [vmem:[#allocation10 + $0x348] sm:$0xff]  ;;  %v974_v16 = vld [vmem:[#allocation10 + $0x358] sm:$0xff] }
 0x26a   :  { %1517 = vmatprep.subr.bf16.mxu1 %v1516_v26  ;;  %v935_v26 = vld [vmem:[#allocation10 + $0x220] sm:$0xff]  ;;  %v1556_v19 = vpack.c.bf16 %v974_v16, %v972_v15 }
 0x2ba   :  { %v523_v32 = vpop.f32.mrb[2].mxu0 }
 0x2bb   :  { %v677_v34 = vadd.f32 %v1923_v3, %v523_v32  ;;  %v525_v35 = vpop.f32.mrb[3].mxu0  ;;  %v940_v32 = vld [vmem:[#allocation10 + $0x248] sm:$0xff] }
 0x2bc   :  { %v679_v36 = vadd.f32 %v1925_v8, %v525_v35 }
 0x2bd   :  { %v774_v37 = vadd.f32 %v757_v31, %v677_v34  ;;  %v937_v31 = vld [vmem:[#allocation10 + $0x230] sm:$0xff] }
 0x2be   :  { %v775_v38 = vadd.f32 %v761_v33, %v679_v36  ;;  %v942_v33 = vld [vmem:[#allocation10 + $0x258] sm:$0xff]  ;;  %v1522_v34 = vpack.c.bf16 %v937_v31, %v935_v26  ;;  %v939_v36 = vld [vmem:[#allocation10 + $0x240] sm:$0xff] }
 0x2bf   :  { %v778_v39 = vsel %vm106_vm0, %v774_v37, 0.0  ;;  %v1524_v35 = vpack.c.bf16 %v942_v33, %v940_v32  ;;  %v975_v31 = vld [vmem:[#allocation10 + $0x360] sm:$0xff]  ;;  %v977_v32 = vld [vmem:[#allocation10 + $0x370] sm:$0xff]  ;;  %v980_v33 = vld [vmem:[#allocation10 + $0x388] sm:$0xff] }
 0x2c0   :  { %v779_v41 = vrot.slane %v778_v39, 4  ;;  %v785_v42 = vsel %vm106_vm0, %v775_v38, 0.0 }
 0x2c1   :  { %v786_v43 = vrot.slane %v785_v42, 4 }
 0x2c2   :  { %v780_v44 = vadd.f32 %v779_v41, %v778_v39  ;;  %v946_v39 = vld [vmem:[#allocation10 + $0x278] sm:$0xff] }
 0x2c3   :  { %v787_v45 = vadd.f32 %v786_v43, %v785_v42  ;;  %v943_v43 = vld [vmem:[#allocation10 + $0x260] sm:$0xff] }
 0x2c4   :  { %v781_v46 = vrot.slane %v780_v44, 2 }
 0x2c5   :  { %v788_v47 = vrot.slane %v787_v45, 2 }
 0x2c6   :  { %v782_v48 = vadd.f32 %v781_v46, %v780_v44  ;;  %v945_v44 = vld [vmem:[#allocation10 + $0x270] sm:$0xff]  ;;  %v950_v46 = vld [vmem:[#allocation10 + $0x298] sm:$0xff] }
 0x2c7   :  { %v789_v40 = vadd.f32 %v788_v47, %v787_v45  ;;  %v948_v45 = vld [vmem:[#allocation10 + $0x288] sm:$0xff]  ;;  %v1530_v47 = vpack.c.bf16 %v945_v44, %v943_v43  ;;  %v983_v44 = vld [vmem:[#allocation10 + $0x3a0] sm:$0xff] }
 0x2c8   :  { %v783_v49 = vrot.slane %v782_v48, 1 }
 0x2c9   :  { %v790_v50 = vrot.slane %v789_v40, 1 }
 0x2ca   :  { %v784_v3 = vadd.f32 %v783_v49, %v782_v48  ;;  %v1532_v48 = vpack.c.bf16 %v950_v46, %v948_v45  ;;  %v949_v49 = vld [vmem:[#allocation10 + $0x290] sm:$0xff]  ;;  %v988_v46 = vld [vmem:[#allocation10 + $0x3c8] sm:$0xff] }
 0x2cb   :  { %v791_v27 = vadd.f32 %v790_v50, %v789_v40  ;;  %v947_v40 = vld [vmem:[#allocation10 + $0x280] sm:$0xff]  ;;  %v952_v50 = vld [vmem:[#allocation10 + $0x2a8] sm:$0xff]  ;;  %v985_v45 = vld [vmem:[#allocation10 + $0x3b0] sm:$0xff] }
 0x2cc   :  { %v807_v51 = vmul.f32 0.5, %v784_v3  ;;  %v954_v3 = vld [vmem:[#allocation10 + $0x2b8] sm:$0xff] }
 0x2cd   :  { %v808_v8 = vmul.f32 0.5, %v791_v27  ;;  %v1534_v27 = vpack.c.bf16 %v949_v49, %v947_v40  ;;  %v987_v49 = vld [vmem:[#allocation10 + $0x3c0] sm:$0xff] }
 0x2ce   :  { %v811_v54 = vsub.f32 %v774_v37, %v807_v51  ;;  %v941_v37 = vld [vmem:[#allocation10 + $0x250] sm:$0xff]  ;;  %v1536_v51 = vpack.c.bf16 %v954_v3, %v952_v50  ;;  %v992_v3 = vld [vmem:[#allocation10 + $0x3e8] sm:$0xff] }
 0x2cf   :  { %v812_v53 = vsub.f32 %v775_v38, %v808_v8  ;;  %v944_v38 = vld [vmem:[#allocation10 + $0x268] sm:$0xff]  ;;  %v1526_v41 = vpack.c.bf16 %v941_v37, %v939_v36  ;;  %v951_v8 = vld [vmem:[#allocation10 + $0x2a0] sm:$0xff]  ;;  %v989_v50 = vld [vmem:[#allocation10 + $0x3d0] sm:$0xff] }
 0x2d0   :  { %v815_v52 = vmul.f32 %v811_v54, %v811_v54  ;;  %v1528_v42 = vpack.c.bf16 %v946_v39, %v944_v38  ;;  %v979_v37 = vld [vmem:[#allocation10 + $0x380] sm:$0xff]  ;;  %v981_v38 = vld [vmem:[#allocation10 + $0x390] sm:$0xff]  ;;  %v984_v39 = vld [vmem:[#allocation10 + $0x3a8] sm:$0xff] }
 0x2d1   :  { %v816_v55 = vmul.f32 %v812_v53, %v812_v53 }
 0x2d2   :  { %v819_v56 = vsel %vm106_vm0, %v815_v52, 0.0  ;;  %v958_v52 = vld [vmem:[#allocation10 + $0x2d8] sm:$0xff] }
 0x2d3   :  { %v820_v57 = vrot.slane %v819_v56, 4  ;;  %v826_v58 = vsel %vm106_vm0, %v816_v55, 0.0 }
 0x2d4   :  { %v827_v59 = vrot.slane %v826_v58, 4 }
 0x2d5   :  { %v821_v60 = vadd.f32 %v820_v57, %v819_v56  ;;  %v955_v57 = vld [vmem:[#allocation10 + $0x2c0] sm:$0xff] }
 0x2d6   :  { %v828_v61 = vadd.f32 %v827_v59, %v826_v58  ;;  %v957_v58 = vld [vmem:[#allocation10 + $0x2d0] sm:$0xff]  ;;  %v960_v59 = vld [vmem:[#allocation10 + $0x2e8] sm:$0xff] }
 0x2d7   :  { %v822_v62 = vrot.slane %v821_v60, 2 }
 0x2d8   :  { %v829_v63 = vrot.slane %v828_v61, 2 }
 0x2d9   :  { %v823_v0 = vadd.f32 %v822_v62, %v821_v60  ;;  %v962_v60 = vld [vmem:[#allocation10 + $0x2f8] sm:$0xff] }
 0x2da   :  { %v830_v1 = vadd.f32 %v829_v63, %v828_v61  ;;  %v1542_v61 = vpack.c.bf16 %v957_v58, %v955_v57  ;;  %v1544_v62 = vpack.c.bf16 %v962_v60, %v960_v59  ;;  %v959_v63 = vld [vmem:[#allocation10 + $0x2e0] sm:$0xff] }
 0x2db   :  { %v824_v2 = vrot.slane %v823_v0, 1 }
 0x2dc   :  { %v831_v4 = vrot.slane %v830_v1, 1 }
 0x2dd   :  { %v825_v5 = vadd.f32 %v824_v2, %v823_v0  ;;  %v961_v0 = vld [vmem:[#allocation10 + $0x2f0] sm:$0xff]  ;;  %v966_v2 = vld [vmem:[#allocation10 + $0x318] sm:$0xff] }
 0x2de   :  { %v832_v6 = vadd.f32 %v831_v4, %v830_v1  ;;  %v964_v1 = vld [vmem:[#allocation10 + $0x308] sm:$0xff]  ;;  %v1546_v4 = vpack.c.bf16 %v961_v0, %v959_v63 }
 0x2df   :  { %v847_v7 = vmul.f32 0.5, %v825_v5  ;;  %v1548_v5 = vpack.c.bf16 %v966_v2, %v964_v1 }
 0x2e0   :  { %v848_v9 = vmul.f32 0.5, %v832_v6  ;;  %v963_v6 = vld [vmem:[#allocation10 + $0x300] sm:$0xff] }
 0x2e1   :  { %v851_v10 = vadd.f32 1e-05, %v847_v7  ;;  %v965_v7 = vld [vmem:[#allocation10 + $0x310] sm:$0xff] }
 0x2e2   :  { %v852_v11 = vadd.f32 1e-05, %v848_v9  ;;  %v968_v9 = vld [vmem:[#allocation10 + $0x328] sm:$0xff] }
 0x2e3   :  { %1605 = vrsqrt.f32 %v851_v10  ;;  %v970_v10 = vld [vmem:[#allocation10 + $0x338] sm:$0xff] }
 0x2e4   :  { %1607 = vrsqrt.f32 %v852_v11  ;;  %v1550_v11 = vpack.c.bf16 %v965_v7, %v963_v6 }
 0x2ed   :  { %v1606_v12 = vpop.eup %1605 }
 0x2ee   :  { %v1608_v13 = vpop.eup %1607  ;;  %v859_v14 = vmul.f32 %v1606_v12, %v811_v54  ;;  %v953_v54 = vld [vmem:[#allocation10 + $0x2b0] sm:$0xff]  ;;  %v1552_v12 = vpack.c.bf16 %v970_v10, %v968_v9 }
 0x2ef   :  { %v860_v18 = vmul.f32 %v1608_v13, %v812_v53  ;;  %v956_v53 = vld [vmem:[#allocation10 + $0x2c8] sm:$0xff]  ;;  %v1538_v55 = vpack.c.bf16 %v953_v54, %v951_v8  ;;  %v967_v13 = vld [vmem:[#allocation10 + $0x320] sm:$0xff] }
 0x2f0   :  { %v863_v24 = vmax.f32 %v859_v14, 0.0  ;;  %v1540_v56 = vpack.c.bf16 %v958_v52, %v956_v53  ;;  %v969_v14 = vld [vmem:[#allocation10 + $0x330] sm:$0xff]  ;;  %v991_v54 = vld [vmem:[#allocation10 + $0x3e0] sm:$0xff] }
 0x2f1   :  { %v864_v22 = vmax.f32 %v860_v18, 0.0  ;;  %v1554_v18 = vpack.c.bf16 %v969_v14, %v967_v13  ;;  %v993_v53 = vld [vmem:[#allocation10 + $0x3f0] sm:$0xff] }
 0x2f2   :  { %v1578_v52 = vpack.c.bf16 %v993_v53, %v991_v54 }
 0x2f3   :  { %1071 = vmatprep.mubr.f32.mxu1 %v864_v22  ;;  %v973_v22 = vld [vmem:[#allocation10 + $0x350] sm:$0xff] }
 0x2f4   :  { %1072 = vmatmul.mubr.f32.vlgmr.msra.gmra.mrb[2].mxu1 %v863_v24  ;;  %v978_v24 = vld [vmem:[#allocation10 + $0x378] sm:$0xff] }
 0x2f5   :  { %1519 = vmatpush1.bf16.msra.mxu1 %v1518_v23  ;;  %v976_v23 = vld [vmem:[#allocation10 + $0x368] sm:$0xff] }
 0x2f6   :  { %1521 = vmatprep.subr.bf16.mxu1 %v1520_v25  ;;  %v1558_v25 = vpack.c.bf16 %v973_v22, %v971_v20  ;;  %v1560_v26 = vpack.c.bf16 %v978_v24, %v976_v23 }
 0x2f9   :  { %1523 = vmatpush1.bf16.msra.mxu1 %v1522_v34  ;;  %v982_v34 = vld [vmem:[#allocation10 + $0x398] sm:$0xff] }
 0x2fa   :  { %1525 = vmatprep.subr.bf16.mxu1 %v1524_v35  ;;  %v1562_v35 = vpack.c.bf16 %v977_v32, %v975_v31  ;;  %v1564_v36 = vpack.c.bf16 %v982_v34, %v980_v33 }
 0x2fd   :  { %1527 = vmatpush1.bf16.msra.mxu1 %v1526_v41  ;;  %v986_v41 = vld [vmem:[#allocation10 + $0x3b8] sm:$0xff] }
 0x2fe   :  { %1529 = vmatprep.subr.bf16.mxu1 %v1528_v42  ;;  %v1566_v42 = vpack.c.bf16 %v981_v38, %v979_v37  ;;  %v1568_v43 = vpack.c.bf16 %v986_v41, %v984_v39 }
 0x301   :  { %1531 = vmatpush1.bf16.msra.mxu1 %v1530_v47  ;;  %v990_v47 = vld [vmem:[#allocation10 + $0x3d8] sm:$0xff] }
 0x302   :  { %1533 = vmatprep.subr.bf16.mxu1 %v1532_v48  ;;  %v1570_v48 = vpack.c.bf16 %v985_v45, %v983_v44  ;;  %v1572_v40 = vpack.c.bf16 %v990_v47, %v988_v46 }
 0x305   :  { %1535 = vmatpush1.bf16.msra.mxu1 %v1534_v27  ;;  %v994_v27 = vld [vmem:[#allocation10 + $0x3f8] sm:$0xff] }
 0x306   :  { %1537 = vmatprep.subr.bf16.mxu1 %v1536_v51  ;;  %v1574_v51 = vpack.c.bf16 %v989_v50, %v987_v49  ;;  %v1576_v8 = vpack.c.bf16 %v994_v27, %v992_v3  ;;  %v995_v50 = vld [vmem:[%s1982_s7] sm:$0x3]  ;;  %s1771_s7 = smov [#allocation11]  }
 0x307   :  { %v1000_v3 = vrot.slane %v995_v50, %v756_v28  ;;  %v1004_v27 = vrot.slane %v995_v50, %v760_v30  ;;  %s1176_s25 = sshll.u32 %s1771_s7, 4  ;;  %v1617_v28 = vld [vmem:[#allocation2] sm:$0xf]  ;;  %s1177_s25 = int_to_ptr.vmem [resolvable:$true] %s1176_s25 }
 0x308   :  { %s1729_s26 = scalar_lea.vmem %s1177_s25, 64  ;;  %p1734_p13 = scmp.lt.s32.totalorder %s1177_s25, %s1177_s25 }
 0x309   :  { %1539 = vmatpush1.bf16.msra.mxu1 %v1538_v55  ;;  %v764_v55 = vsub.s32 2, %v1903_v17  ;;  %p1730_p12 = scmp.ne.s32.totalorder %s1177_s25, %s1729_s26  ;;  %p1735_p0 = scmp.lt.s32.totalorder %s1729_s26, %s1729_s26 }
 0x30a   :  { %1541 = vmatprep.subr.bf16.mxu1 %v1540_v56  ;;  %v768_v56 = vsub.s32 3, %v1903_v17 }
 0x30b   :  { %v765_v57 = vrot.slane %v1932_v29, %v764_v55  ;;  %p1736_p1 = por %p1735_p0, %p1734_p13 }
 0x30c   :  { %v769_v58 = vrot.slane %v1932_v29, %v768_v56 }
 0x30d   :  { %1543 = vmatpush1.bf16.msra.mxu1 %v1542_v61  ;;  %p1737_p2 = pnand %p1736_p1, %p1730_p12 }
 0x30e   :  { %1545 = vmatprep.subr.bf16.mxu1 %v1544_v62 }
 0x311   :  { %1547 = vmatpush1.bf16.msra.mxu1 %v1546_v4 }
 0x312   :  { %1549 = vmatprep.subr.bf16.mxu1 %v1548_v5 }
 0x315   :  { %1551 = vmatpush1.bf16.msra.mxu1 %v1550_v11 }
 0x316   :  { %1553 = vmatprep.subr.bf16.mxu1 %v1552_v12 }
 0x319   :  { %1555 = vmatpush1.bf16.msra.mxu1 %v1554_v18 }
 0x31a   :  { %1557 = vmatprep.subr.bf16.mxu1 %v1556_v19 }
 0x31d   :  { %1559 = vmatpush1.bf16.msra.mxu1 %v1558_v25 }
 0x31e   :  { %1561 = vmatprep.subr.bf16.mxu1 %v1560_v26 }
 0x321   :  { %1563 = vmatpush1.bf16.msra.mxu1 %v1562_v35 }
 0x322   :  { %1565 = vmatprep.subr.bf16.mxu1 %v1564_v36 }
 0x325   :  { %1567 = vmatpush1.bf16.msra.mxu1 %v1566_v42 }
 0x326   :  { %1569 = vmatprep.subr.bf16.mxu1 %v1568_v43 }
 0x329   :  { %1571 = vmatpush1.bf16.msra.mxu1 %v1570_v48 }
 0x32a   :  { %1573 = vmatprep.subr.bf16.mxu1 %v1572_v40 }
 0x32d   :  { %1575 = vmatpush1.bf16.msra.mxu1 %v1574_v51 }
 0x32e   :  { %1577 = vmatprep.subr.bf16.mxu1 %v1576_v8 }
 0x331   :  { %1579 = vmatpush1.bf16.msra.mxu1 %v1578_v52 }
 0x33a   :  { %v747_v59 = vpop.f32.mrb[4].mxu0 }
 0x33b   :  { %v776_v60 = vadd.f32 %v765_v57, %v747_v59  ;;  %v749_v61 = vpop.f32.mrb[5].mxu0 }
 0x33c   :  { %v777_v62 = vadd.f32 %v769_v58, %v749_v61 }
 0x33d   :  { %v792_v63 = vsel %vm106_vm0, %v776_v60, 0.0 }
 0x33e   :  { %v793_v0 = vrot.slane %v792_v63, 4  ;;  %v799_v1 = vsel %vm106_vm0, %v777_v62, 0.0 }
 0x33f   :  { %v800_v2 = vrot.slane %v799_v1, 4 }
 0x340   :  { %v794_v4 = vadd.f32 %v793_v0, %v792_v63 }
 0x341   :  { %v801_v5 = vadd.f32 %v800_v2, %v799_v1 }
 0x342   :  { %v795_v6 = vrot.slane %v794_v4, 2 }
 0x343   :  { %v802_v7 = vrot.slane %v801_v5, 2 }
 0x344   :  { %v796_v9 = vadd.f32 %v795_v6, %v794_v4 }
 0x345   :  { %v803_v10 = vadd.f32 %v802_v7, %v801_v5 }
 0x346   :  { %v797_v11 = vrot.slane %v796_v9, 1 }
 0x347   :  { %v804_v12 = vrot.slane %v803_v10, 1 }
 0x348   :  { %v798_v13 = vadd.f32 %v797_v11, %v796_v9 }
 0x349   :  { %v805_v29 = vadd.f32 %v804_v12, %v803_v10 }
 0x34a   :  { %v809_v14 = vmul.f32 0.5, %v798_v13 }
 0x34b   :  { %v810_v15 = vmul.f32 0.5, %v805_v29 }
 0x34c   :  { %v813_v16 = vsub.f32 %v776_v60, %v809_v14 }
 0x34d   :  { %v814_v18 = vsub.f32 %v777_v62, %v810_v15 }
 0x34e   :  { %v817_v19 = vmul.f32 %v813_v16, %v813_v16 }
 0x34f   :  { %v818_v20 = vmul.f32 %v814_v18, %v814_v18 }
 0x350   :  { %v833_v22 = vsel %vm106_vm0, %v817_v19, 0.0 }
 0x351   :  { %v834_v23 = vrot.slane %v833_v22, 4  ;;  %v840_v24 = vsel %vm106_vm0, %v818_v20, 0.0 }
 0x352   :  { %v841_v25 = vrot.slane %v840_v24, 4 }
 0x353   :  { %v835_v26 = vadd.f32 %v834_v23, %v833_v22 }
 0x354   :  { %v842_v31 = vadd.f32 %v841_v25, %v840_v24 }
 0x355   :  { %v836_v32 = vrot.slane %v835_v26, 2 }
 0x356   :  { %v843_v33 = vrot.slane %v842_v31, 2 }
 0x357   :  { %v837_v34 = vadd.f32 %v836_v32, %v835_v26 }
 0x358   :  { %v844_v35 = vadd.f32 %v843_v33, %v842_v31 }
 0x359   :  { %v838_v36 = vrot.slane %v837_v34, 1 }
 0x35a   :  { %v845_v37 = vrot.slane %v844_v35, 1 }
 0x35b   :  { %v839_v38 = vadd.f32 %v838_v36, %v837_v34 }
 0x35c   :  { %v846_v39 = vadd.f32 %v845_v37, %v844_v35 }
 0x35d   :  { %v849_v41 = vmul.f32 0.5, %v839_v38 }
 0x35e   :  { %v850_v42 = vmul.f32 0.5, %v846_v39 }
 0x35f   :  { %v853_v43 = vadd.f32 1e-05, %v849_v41 }
 0x360   :  { %v854_v44 = vadd.f32 1e-05, %v850_v42 }
 0x361   :  { %1609 = vrsqrt.f32 %v853_v43 }
 0x362   :  { %1611 = vrsqrt.f32 %v854_v44 }
 0x36b   :  { %v1610_v45 = vpop.eup %1609 }
 0x36c   :  { %v1612_v46 = vpop.eup %1611  ;;  %v861_v47 = vmul.f32 %v1610_v45, %v813_v16 }
 0x36d   :  { %v862_v48 = vmul.f32 %v1612_v46, %v814_v18 }
 0x36e   :  { %v865_v49 = vmax.f32 %v861_v47, 0.0 }
 0x36f   :  { %v866_v40 = vmax.f32 %v862_v48, 0.0 }
 0x371   :  { %1142 = vmatprep.mubr.f32.mxu1 %v866_v40 }
 0x372   :  { %1143 = vmatmul.mubr.f32.vlgmr.msra.gmra.mrb[2].mxu1 %v865_v49 }
 0x445   :  { %v1144_v51 = vpop.f32.mrb[2].mxu1 }
 0x446   :  { %v1582_v8 = vadd.f32 %v1144_v51, %v1000_v3  ;;  %v1146_v54 = vpop.f32.mrb[3].mxu1 }
 0x447   :  { %v1583_v53 = vadd.f32 %v1146_v54, %v1004_v27 }
 0x448   :  { %1613 = vtanh.f32 %v1582_v8 }
 0x449   :  { %1615 = vtanh.f32 %v1583_v53 }
 0x452   :  { %v1614_v52 = vpop.eup %1613 }
 0x453   :  { %v1616_v55 = vpop.eup %1615  ;;  %v1151_v56 = vmul.f32 0.5, %v1614_v52 }
 0x454   :  { %v1152_v57 = vmul.f32 0.5, %v1616_v55 }
 0x455   :  { %v1153_v58 = vadd.f32 0.5, %v1151_v56 }
 0x456   :  { %v1154_v59 = vadd.f32 0.5, %v1152_v57 }
 0x457   :  { %v1155_v60 = vmul.f32 0.1, %v1153_v58 }
 0x458   :  { %v1156_v61 = vmul.f32 0.1, %v1154_v59 }
 0x45a   :  { %v1159_v62 = vcombine.low %v1155_v60, %v1156_v61 }
 0x45c   :  { %v1166_v17 = vrot.slane %v1159_v62, %v1906_v21 }
 0x45e   :  { %v1168_v30 = vadd.f32 %v1617_v28, %v1166_v17 }
 0x460   :  { %1169 = vst [vmem:[#allocation11] sm:$0xf] %v1168_v30 }
 0x461   :  { %1740 = shalt.err (!%p1737_p2)
}
 0x462   :  { %s1741_s30 = scalar_lea.hbm %s1983_s8, 64 }
 0x463   :  { %p1742_p3 = scmp.ne.s32.totalorder %s1983_s8, %s1741_s30  ;;  %p1745_p4 = scmp.lt.u32.totalorder %s1741_s30, %s1983_s8 }
 0x465   :  { %p1747_p5 = pnand %p1745_p4, %p1742_p3 }
 0x467   :  { %1750 = shalt.err (!%p1747_p5)
}
 0x468   :  { %1179 = dma.vmem_to_hbm [thread:$0]  %s1177_s25, 64, %s1983_s8, [#allocation4]  }
 0x469   :  { %1757 = dma.done.wait [#allocation4], 64  }
 0x46a   :  { %1758 = vsyncadd [#allocation4], 4294967232 }
 0x46b   :  { %1183 = vsyncpa [#allocation3], 1 }
 0x46c   :  { %1184 = vsyncpa [#allocation6], 1 }
 0x46d   :  { %1185 = vsyncpa [#allocation9], 1 }
 0x46e   :  { %1186 = vsyncpa [#allocation4], 1 }

</bundles_post_ra>
